<compile_context>
chip_gen: v7x
topology: tpu7x:2x2x1
jax: 0.10.0
libtpu: 0.0.40
codegen_flags: <defaults>
</compile_context>

<pallas_src>
import functools

import jax
import jax.numpy as jnp
from jax.experimental import pallas as pl
from jax.experimental.pallas import tpu as pltpu


def _round_up(v, m):
    return ((v + m - 1) // m) * m


def _cdiv(a, b):
    return -(-a // b)


# ----------------------------- fused Pallas kernel ----------------------------- #

def _lenet_kernel(xb_ref, w1_ref, b1_ref, w2_ref, b2_ref,
                  wl1_ref, bl1_ref, wl2_ref, bl2_ref, wl3_ref, bl3_ref,
                  o_ref):
    f32 = jnp.float32
    bf16 = jnp.bfloat16
    tb = xb_ref.shape[1]                       # images per grid step (multiple of 16)

    # ---- conv1 (1->6, 5x5): single K=140 MXU matmul on the pre-banded image --- #
    xb = xb_ref[...].reshape(24 * tb, 140)     # rows = (oh, n), lanes = (ki, w)
    acc1 = jnp.dot(xb, w1_ref[...], preferred_element_type=f32)
    y1 = jnp.tanh((acc1 + b1_ref[...]).astype(bf16))   # (24*tb,144), lanes=(ow,co)

    # ---- 2x2 avg-pool #1, H half (both 0.5 factors folded into conv2 weights) - #
    y1 = y1.reshape(12, 2, tb, 144)            # whole-tile regroup (tb % 16 == 0)
    h1 = y1[:, 0] + y1[:, 1]                   # (12, tb, 144) bf16

    # ---- conv2 (6->16, 5x5) + folded pool1, 5 banded MXU matmuls --------------- #
    acc2 = jnp.dot(h1[0:8].reshape(8 * tb, 144), w2_ref[0],
                   preferred_element_type=f32)
    for i in range(1, 5):
        acc2 = acc2 + jnp.dot(h1[i:i + 8].reshape(8 * tb, 144), w2_ref[i],
                              preferred_element_type=f32)
    y2 = jnp.tanh((acc2 + b2_ref[...]).astype(bf16))   # (8*tb,128), lanes=(ow2,co)

    # ---- 2x2 avg-pool #2, H half (both 0.5 factors folded into L1 weights) ---- #
    y2 = y2.reshape(4, 2, tb, 128)
    h2 = y2[:, 0] + y2[:, 1]                   # (4, tb, 128) bf16

    # ---- L1 (256->120, padded to 128), single K=512 matmul (lane-aligned cat) - #
    hcat = jnp.concatenate([h2[0], h2[1], h2[2], h2[3]], axis=-1)   # (tb, 512)
    h3 = jnp.tanh((jnp.dot(hcat, wl1_ref[...], preferred_element_type=f32)
                   + bl1_ref[...]).astype(bf16))        # (tb, 128)

    # ---- L2 (120->84, padded to 128) ------------------------------------------ #
    h4 = jnp.tanh((jnp.dot(h3, wl2_ref[...], preferred_element_type=f32)
                   + bl2_ref[...]).astype(bf16))        # (tb, 128)

    # ---- L3 (84->10, padded to 128 lanes for a lane-dense HBM store) ----------- #
    out = jnp.dot(h4, wl3_ref[...], preferred_element_type=f32) + bl3_ref[...]
    o_ref[...] = out.astype(o_ref.dtype)


# ------------------------- wrapper-side weight folding ------------------------- #

def _build_kernel_weights(params):
    """Fold conv->banded matrices, both avg-pool halves (0.25) and the NCHW
    flatten order into the weights; pad the FC stack to 128 lanes."""
    f32, bf16 = jnp.float32, jnp.bfloat16

    # conv1 merged bands: W1m[i*28+w, ow*6+co] = conv1_w[co,0,i,w-ow] (0<=w-ow<5)
    w_in = jnp.arange(28)[:, None]
    ow = jnp.arange(24)[None, :]
    j = w_in - ow
    valid = (j >= 0) & (j < 5)
    jc = jnp.clip(j, 0, 4)
    w1 = params["conv1_w"].astype(f32)                  # (6,1,5,5)
    g1 = w1[:, 0][:, :, jc]                             # (6,5,28,24) [co,i,w,ow]
    g1 = jnp.where(valid[None, None], g1, 0.0)
    W1m = jnp.transpose(g1, (1, 2, 3, 0)).reshape(140, 144)
    b1 = jnp.tile(params["conv1_b"].astype(f32), 24).reshape(1, 144)

    # conv2 bands with the FULL pool1 (0.25) folded:
    # W2b[i, w*6+ci, ow2*16+co] = 0.25 * conv2_w[co, ci, i, (w//2)-ow2]
    w_in2 = jnp.arange(24)[:, None]
    ow2 = jnp.arange(8)[None, :]
    j2 = (w_in2 // 2) - ow2
    valid2 = (j2 >= 0) & (j2 < 5)
    j2c = jnp.clip(j2, 0, 4)
    w2 = params["conv2_w"].astype(f32)                  # (16,6,5,5)
    g2 = w2[:, :, :, j2c]                               # (16,6,5,24,8) [co,ci,i,w,ow2]
    g2 = jnp.where(valid2[None, None, None], g2, 0.0) * 0.25
    W2b = jnp.transpose(g2, (2, 3, 1, 4, 0)).reshape(5, 144, 128)
    b2 = jnp.tile(params["conv2_b"].astype(f32), 8).reshape(1, 128)

    # L1 with the FULL pool2 (0.25) + PyTorch NCHW flatten order folded, merged
    # over the 4 pooled-H rows (lane index = hp*128 + ow2*16 + c), padded to 128.
    l1 = params["L1_w"].astype(f32).reshape(120, 16, 4, 4)   # [o, c, hp, wp]
    g3 = l1[:, :, :, jnp.arange(8) // 2]                # (120,16,4,8) [o,c,hp,ow2]
    WL1 = 0.25 * jnp.transpose(g3, (2, 3, 1, 0)).reshape(512, 120)
    WL1 = jnp.zeros((512, 128), f32).at[:, :120].set(WL1)
    bL1 = jnp.zeros((1, 128), f32).at[0, :120].set(params["L1_b"].astype(f32))

    WL2 = jnp.zeros((128, 128), f32).at[:120, :84].set(params["L2_w"].astype(f32).T)
    bL2 = jnp.zeros((1, 128), f32).at[0, :84].set(params["L2_b"].astype(f32))

    WL3 = jnp.zeros((128, 128), f32).at[:84, :10].set(params["L3_w"].astype(f32).T)
    bL3 = jnp.zeros((1, 128), f32).at[0, :10].set(params["L3_b"].astype(f32))

    return (W1m.astype(bf16), b1, W2b.astype(bf16), b2,
            WL1.astype(bf16), bL1, WL2.astype(bf16), bL2,
            WL3.astype(bf16), bL3)


def _choose_tile(n_images, block_n):
    """Batch tile (multiple of 16) and padded batch.  Prefer >=2 grid steps so
    both v7x TensorCores get work; cap the tile at block_n."""
    n = _round_up(max(n_images, 1), 16)
    steps = max(_cdiv(n, block_n), 1)
    if steps == 1 and n >= 32:
        steps = 2
    tb = _round_up(_cdiv(n, steps), 16)
    return tb, steps * tb


@functools.partial(jax.jit, static_argnames=("block_n",))
def lenet_forward(params, x, block_n=256):
    """x: (N, 1, 28, 28) NCHW float32 -> logits (N, 10)."""
    N = x.shape[0]
    weights = _build_kernel_weights(params)
    tb, Np = _choose_tile(N, block_n)

    # layout plumbing only: pre-band the raw image so conv1 is ONE K=140 matmul
    #   xb[oh, n, i*28 + w] = x[n, 0, oh+i, w],  oh in 0..23, i in 0..4
    x2 = x[:, 0, :, :].astype(jnp.bfloat16)                       # (N, 28, 28)
    rows = jnp.arange(24)[:, None] + jnp.arange(5)[None, :]       # (24, 5)
    xb = jnp.transpose(x2[:, rows, :], (1, 0, 2, 3)).reshape(24, N, 140)
    xb = jnp.pad(xb, ((0, 0), (0, Np - N), (0, 0)))

    per_img_flops = 2 * (24 * 140 * 144 + 5 * 8 * 144 * 128
                         + 512 * 128 + 128 * 128 + 128 * 128)
    per_img_trans = 24 * 144 + 8 * 128 + 128 + 128

    out = pl.pallas_call(
        _lenet_kernel,
        out_shape=jax.ShapeDtypeStruct((Np, 128), jnp.float32),
        grid=(Np // tb,),
        in_specs=[
            pl.BlockSpec((24, tb, 140), lambda b: (0, b, 0)),    # pre-banded image
            pl.BlockSpec((140, 144), lambda b: (0, 0)),          # conv1 (merged K)
            pl.BlockSpec((1, 144), lambda b: (0, 0)),
            pl.BlockSpec((5, 144, 128), lambda b: (0, 0, 0)),    # conv2 bands (+pool1)
            pl.BlockSpec((1, 128), lambda b: (0, 0)),
            pl.BlockSpec((512, 128), lambda b: (0, 0)),          # L1 (+pool2+flatten)
            pl.BlockSpec((1, 128), lambda b: (0, 0)),
            pl.BlockSpec((128, 128), lambda b: (0, 0)),          # L2 (padded)
            pl.BlockSpec((1, 128), lambda b: (0, 0)),
            pl.BlockSpec((128, 128), lambda b: (0, 0)),          # L3 (padded)
            pl.BlockSpec((1, 128), lambda b: (0, 0)),
        ],
        out_specs=pl.BlockSpec((tb, 128), lambda b: (b, 0)),     # lane-dense logits
        compiler_params=pltpu.CompilerParams(
            dimension_semantics=("parallel",),
            vmem_limit_bytes=40 * 1024 * 1024,
        ),
        cost_estimate=pl.CostEstimate(
            flops=int(Np * per_img_flops),
            transcendentals=int(Np * per_img_trans),
            bytes_accessed=int(Np * (24 * 140 * 2 + 128 * 4) + 500_000),
        ),
    )(xb, *weights)
    return out[:N, :10]


# ------------------------------ pure-JAX reference ----------------------------- #

def lenet_reference(params, x):
    def conv(x, w, b):
        y = jax.lax.conv_general_dilated(
            x, w, window_strides=(1, 1), padding="VALID",
            dimension_numbers=("NCHW", "OIHW", "NCHW"))
        return jnp.tanh(y + b[None, :, None, None])

    def pool(y):
        n, c, h, w = y.shape
        return y.reshape(n, c, h // 2, 2, w // 2, 2).mean(axis=(3, 5))

    y = pool(conv(x, params["conv1_w"], params["conv1_b"]))
    y = pool(conv(y, params["conv2_w"], params["conv2_b"]))
    flat = y.reshape(y.shape[0], -1)
    h = jnp.tanh(flat @ params["L1_w"].T + params["L1_b"])
    h = jnp.tanh(h @ params["L2_w"].T + params["L2_b"])
    return h @ params["L3_w"].T + params["L3_b"]


def init_params(key):
    """Deterministic init mimicking PyTorch default U(-1/sqrt(fan_in), 1/sqrt(fan_in))."""
    def u(k, shape, fan_in):
        bound = 1.0 / float(fan_in) ** 0.5
        return jax.random.uniform(k, shape, jnp.float32, -bound, bound)

    ks = jax.random.split(key, 10)
    return {
        "conv1_w": u(ks[0], (6, 1, 5, 5), 1 * 5 * 5),
        "conv1_b": u(ks[1], (6,), 1 * 5 * 5),
        "conv2_w": u(ks[2], (16, 6, 5, 5), 6 * 5 * 5),
        "conv2_b": u(ks[3], (16,), 6 * 5 * 5),
        "L1_w": u(ks[4], (120, 256), 256),
        "L1_b": u(ks[5], (120,), 256),
        "L2_w": u(ks[6], (84, 120), 120),
        "L2_b": u(ks[7], (84,), 120),
        "L3_w": u(ks[8], (10, 84), 84),
        "L3_b": u(ks[9], (10,), 84),
    }


if __name__ == "__main__":
    key = jax.random.PRNGKey(0)
    pkey, xkey = jax.random.split(key)
    params = init_params(pkey)

    # Fashion-MNIST-sized input (28x28 required so the flatten yields 256 feats)
    x = jax.random.normal(xkey, (2, 1, 28, 28), jnp.float32)
    out = jax.block_until_ready(lenet_forward(params, x))
    ref = jax.block_until_ready(lenet_reference(params, x))
    assert out.shape == (2, 10) and out.dtype == jnp.float32
    assert float(jnp.max(jnp.abs(out - ref))) < 0.1, "mismatch (small batch)"

    # Also exercise the multi-grid-step / batch-padding path.
    xb_ = jax.random.normal(jax.random.PRNGKey(1), (48, 1, 28, 28), jnp.float32)
    out_b = jax.block_until_ready(lenet_forward(params, xb_))
    ref_b = jax.block_until_ready(lenet_reference(params, xb_))
    assert out_b.shape == (48, 10)
    assert float(jnp.max(jnp.abs(out_b - ref_b))) < 0.1, "mismatch (batched)"

    print("KERNEL_OK")
</pallas_src>

<mosaic_0001>
module attributes {stable_mosaic.version = 11 : i64} {
  func.func @_lenet_kernel(%arg0: i32, %arg1: memref<24x16x140xbf16, #tpu.memory_space<vmem>>, %arg2: memref<140x144xbf16, #tpu.memory_space<vmem>>, %arg3: memref<1x144xf32, #tpu.memory_space<vmem>>, %arg4: memref<5x144x128xbf16, #tpu.memory_space<vmem>>, %arg5: memref<1x128xf32, #tpu.memory_space<vmem>>, %arg6: memref<512x128xbf16, #tpu.memory_space<vmem>>, %arg7: memref<1x128xf32, #tpu.memory_space<vmem>>, %arg8: memref<128x128xbf16, #tpu.memory_space<vmem>>, %arg9: memref<1x128xf32, #tpu.memory_space<vmem>>, %arg10: memref<128x128xbf16, #tpu.memory_space<vmem>>, %arg11: memref<1x128xf32, #tpu.memory_space<vmem>>, %arg12: memref<16x128xf32, #tpu.memory_space<vmem>>) attributes {dimension_semantics = [#tpu.dimension_semantics<parallel>], iteration_bounds = array<i64: 1>, scalar_prefetch = 0 : i64, scratch_operands = 0 : i64, tpu.core_type = #tpu.core_type<tc>, window_params = [{transform_indices = @transform_0, window_bounds = array<i64: 24, 16, 140>}, {pipeline_mode = #tpu.pipeline_mode<synchronous>, transform_indices = @transform_1, window_bounds = array<i64: 140, 144>}, {pipeline_mode = #tpu.pipeline_mode<synchronous>, transform_indices = @transform_2, window_bounds = array<i64: 1, 144>}, {pipeline_mode = #tpu.pipeline_mode<synchronous>, transform_indices = @transform_3, window_bounds = array<i64: 5, 144, 128>}, {pipeline_mode = #tpu.pipeline_mode<synchronous>, transform_indices = @transform_4, window_bounds = array<i64: 1, 128>}, {pipeline_mode = #tpu.pipeline_mode<synchronous>, transform_indices = @transform_5, window_bounds = array<i64: 512, 128>}, {pipeline_mode = #tpu.pipeline_mode<synchronous>, transform_indices = @transform_6, window_bounds = array<i64: 1, 128>}, {pipeline_mode = #tpu.pipeline_mode<synchronous>, transform_indices = @transform_7, window_bounds = array<i64: 128, 128>}, {pipeline_mode = #tpu.pipeline_mode<synchronous>, transform_indices = @transform_8, window_bounds = array<i64: 1, 128>}, {pipeline_mode = #tpu.pipeline_mode<synchronous>, transform_indices = @transform_9, window_bounds = array<i64: 128, 128>}, {pipeline_mode = #tpu.pipeline_mode<synchronous>, transform_indices = @transform_10, window_bounds = array<i64: 1, 128>}, {transform_indices = @transform_11, window_bounds = array<i64: 16, 128>}]} {
    %c0 = arith.constant 0 : index
    %c0_0 = arith.constant 0 : index
    %c0_1 = arith.constant 0 : index
    %0 = vector.load %arg1[%c0, %c0_0, %c0_1] : memref<24x16x140xbf16, #tpu.memory_space<vmem>>, vector<24x16x140xbf16>
    %1 = vector.shape_cast %0 : vector<24x16x140xbf16> to vector<384x140xbf16>
    %c0_2 = arith.constant 0 : index
    %c0_3 = arith.constant 0 : index
    %2 = vector.load %arg2[%c0_2, %c0_3] : memref<140x144xbf16, #tpu.memory_space<vmem>>, vector<140x144xbf16>
    %cst = arith.constant dense<0.000000e+00> : vector<384x144xf32>
    %3 = tpu.matmul %1, %2, %cst {dimension_numbers = #tpu.dot_dimension_numbers<[1], [0], [0], [1], [0, 0, 1, 1], [], []>} : vector<384x140xbf16>, vector<140x144xbf16>, vector<384x144xf32> -> vector<384x144xf32>
    %c0_4 = arith.constant 0 : index
    %c0_5 = arith.constant 0 : index
    %4 = vector.load %arg3[%c0_4, %c0_5] : memref<1x144xf32, #tpu.memory_space<vmem>>, vector<1x144xf32>
    %5 = vector.broadcast %4 : vector<1x144xf32> to vector<384x144xf32>
    %6 = arith.addf %3, %5 : vector<384x144xf32>
    %7 = arith.truncf %6 : vector<384x144xf32> to vector<384x144xbf16>
    %8 = math.tanh %7 : vector<384x144xbf16>
    %9 = vector.shape_cast %8 : vector<384x144xbf16> to vector<12x2x16x144xbf16>
    %10 = vector.extract_strided_slice %9 {offsets = [0, 0, 0, 0], sizes = [12, 1, 16, 144], strides = [1, 1, 1, 1]} : vector<12x2x16x144xbf16> to vector<12x1x16x144xbf16>
    %11 = vector.shape_cast %10 : vector<12x1x16x144xbf16> to vector<12x16x144xbf16>
    %12 = vector.extract_strided_slice %9 {offsets = [0, 1, 0, 0], sizes = [12, 1, 16, 144], strides = [1, 1, 1, 1]} : vector<12x2x16x144xbf16> to vector<12x1x16x144xbf16>
    %13 = vector.shape_cast %12 : vector<12x1x16x144xbf16> to vector<12x16x144xbf16>
    %14 = arith.addf %11, %13 : vector<12x16x144xbf16>
    %15 = vector.extract_strided_slice %14 {offsets = [0, 0, 0], sizes = [8, 16, 144], strides = [1, 1, 1]} : vector<12x16x144xbf16> to vector<8x16x144xbf16>
    %16 = vector.shape_cast %15 : vector<8x16x144xbf16> to vector<128x144xbf16>
    %c0_6 = arith.constant 0 : index
    %c0_7 = arith.constant 0 : index
    %c0_8 = arith.constant 0 : index
    %17 = vector.load %arg4[%c0_6, %c0_7, %c0_8] : memref<5x144x128xbf16, #tpu.memory_space<vmem>>, vector<1x144x128xbf16>
    %18 = vector.shape_cast %17 : vector<1x144x128xbf16> to vector<144x128xbf16>
    %cst_9 = arith.constant dense<0.000000e+00> : vector<128x128xf32>
    %19 = tpu.matmul %16, %18, %cst_9 {dimension_numbers = #tpu.dot_dimension_numbers<[1], [0], [0], [1], [0, 0, 1, 1], [], []>} : vector<128x144xbf16>, vector<144x128xbf16>, vector<128x128xf32> -> vector<128x128xf32>
    %20 = vector.extract_strided_slice %14 {offsets = [1, 0, 0], sizes = [8, 16, 144], strides = [1, 1, 1]} : vector<12x16x144xbf16> to vector<8x16x144xbf16>
    %21 = vector.shape_cast %20 : vector<8x16x144xbf16> to vector<128x144xbf16>
    %c1 = arith.constant 1 : index
    %c0_10 = arith.constant 0 : index
    %c0_11 = arith.constant 0 : index
    %22 = vector.load %arg4[%c1, %c0_10, %c0_11] : memref<5x144x128xbf16, #tpu.memory_space<vmem>>, vector<1x144x128xbf16>
    %23 = vector.shape_cast %22 : vector<1x144x128xbf16> to vector<144x128xbf16>
    %cst_12 = arith.constant dense<0.000000e+00> : vector<128x128xf32>
    %24 = tpu.matmul %21, %23, %cst_12 {dimension_numbers = #tpu.dot_dimension_numbers<[1], [0], [0], [1], [0, 0, 1, 1], [], []>} : vector<128x144xbf16>, vector<144x128xbf16>, vector<128x128xf32> -> vector<128x128xf32>
    %25 = arith.addf %19, %24 : vector<128x128xf32>
    %26 = vector.extract_strided_slice %14 {offsets = [2, 0, 0], sizes = [8, 16, 144], strides = [1, 1, 1]} : vector<12x16x144xbf16> to vector<8x16x144xbf16>
    %27 = vector.shape_cast %26 : vector<8x16x144xbf16> to vector<128x144xbf16>
    %c2 = arith.constant 2 : index
    %c0_13 = arith.constant 0 : index
    %c0_14 = arith.constant 0 : index
    %28 = vector.load %arg4[%c2, %c0_13, %c0_14] : memref<5x144x128xbf16, #tpu.memory_space<vmem>>, vector<1x144x128xbf16>
    %29 = vector.shape_cast %28 : vector<1x144x128xbf16> to vector<144x128xbf16>
    %cst_15 = arith.constant dense<0.000000e+00> : vector<128x128xf32>
    %30 = tpu.matmul %27, %29, %cst_15 {dimension_numbers = #tpu.dot_dimension_numbers<[1], [0], [0], [1], [0, 0, 1, 1], [], []>} : vector<128x144xbf16>, vector<144x128xbf16>, vector<128x128xf32> -> vector<128x128xf32>
    %31 = arith.addf %25, %30 : vector<128x128xf32>
    %32 = vector.extract_strided_slice %14 {offsets = [3, 0, 0], sizes = [8, 16, 144], strides = [1, 1, 1]} : vector<12x16x144xbf16> to vector<8x16x144xbf16>
    %33 = vector.shape_cast %32 : vector<8x16x144xbf16> to vector<128x144xbf16>
    %c3 = arith.constant 3 : index
    %c0_16 = arith.constant 0 : index
    %c0_17 = arith.constant 0 : index
    %34 = vector.load %arg4[%c3, %c0_16, %c0_17] : memref<5x144x128xbf16, #tpu.memory_space<vmem>>, vector<1x144x128xbf16>
    %35 = vector.shape_cast %34 : vector<1x144x128xbf16> to vector<144x128xbf16>
    %cst_18 = arith.constant dense<0.000000e+00> : vector<128x128xf32>
    %36 = tpu.matmul %33, %35, %cst_18 {dimension_numbers = #tpu.dot_dimension_numbers<[1], [0], [0], [1], [0, 0, 1, 1], [], []>} : vector<128x144xbf16>, vector<144x128xbf16>, vector<128x128xf32> -> vector<128x128xf32>
    %37 = arith.addf %31, %36 : vector<128x128xf32>
    %38 = vector.extract_strided_slice %14 {offsets = [4, 0, 0], sizes = [8, 16, 144], strides = [1, 1, 1]} : vector<12x16x144xbf16> to vector<8x16x144xbf16>
    %39 = vector.shape_cast %38 : vector<8x16x144xbf16> to vector<128x144xbf16>
    %c4 = arith.constant 4 : index
    %c0_19 = arith.constant 0 : index
    %c0_20 = arith.constant 0 : index
    %40 = vector.load %arg4[%c4, %c0_19, %c0_20] : memref<5x144x128xbf16, #tpu.memory_space<vmem>>, vector<1x144x128xbf16>
    %41 = vector.shape_cast %40 : vector<1x144x128xbf16> to vector<144x128xbf16>
    %cst_21 = arith.constant dense<0.000000e+00> : vector<128x128xf32>
    %42 = tpu.matmul %39, %41, %cst_21 {dimension_numbers = #tpu.dot_dimension_numbers<[1], [0], [0], [1], [0, 0, 1, 1], [], []>} : vector<128x144xbf16>, vector<144x128xbf16>, vector<128x128xf32> -> vector<128x128xf32>
    %43 = arith.addf %37, %42 : vector<128x128xf32>
    %c0_22 = arith.constant 0 : index
    %c0_23 = arith.constant 0 : index
    %44 = vector.load %arg5[%c0_22, %c0_23] : memref<1x128xf32, #tpu.memory_space<vmem>>, vector<1x128xf32>
    %45 = vector.broadcast %44 : vector<1x128xf32> to vector<128x128xf32>
    %46 = arith.addf %43, %45 : vector<128x128xf32>
    %47 = arith.truncf %46 : vector<128x128xf32> to vector<128x128xbf16>
    %48 = math.tanh %47 : vector<128x128xbf16>
    %49 = vector.shape_cast %48 : vector<128x128xbf16> to vector<4x2x16x128xbf16>
    %50 = vector.extract_strided_slice %49 {offsets = [0, 0, 0, 0], sizes = [4, 1, 16, 128], strides = [1, 1, 1, 1]} : vector<4x2x16x128xbf16> to vector<4x1x16x128xbf16>
    %51 = vector.shape_cast %50 : vector<4x1x16x128xbf16> to vector<4x16x128xbf16>
    %52 = vector.extract_strided_slice %49 {offsets = [0, 1, 0, 0], sizes = [4, 1, 16, 128], strides = [1, 1, 1, 1]} : vector<4x2x16x128xbf16> to vector<4x1x16x128xbf16>
    %53 = vector.shape_cast %52 : vector<4x1x16x128xbf16> to vector<4x16x128xbf16>
    %54 = arith.addf %51, %53 : vector<4x16x128xbf16>
    %55 = vector.extract_strided_slice %54 {offsets = [0, 0, 0], sizes = [1, 16, 128], strides = [1, 1, 1]} : vector<4x16x128xbf16> to vector<1x16x128xbf16>
    %56 = vector.shape_cast %55 : vector<1x16x128xbf16> to vector<16x128xbf16>
    %57 = vector.extract_strided_slice %54 {offsets = [1, 0, 0], sizes = [1, 16, 128], strides = [1, 1, 1]} : vector<4x16x128xbf16> to vector<1x16x128xbf16>
    %58 = vector.shape_cast %57 : vector<1x16x128xbf16> to vector<16x128xbf16>
    %59 = vector.extract_strided_slice %54 {offsets = [2, 0, 0], sizes = [1, 16, 128], strides = [1, 1, 1]} : vector<4x16x128xbf16> to vector<1x16x128xbf16>
    %60 = vector.shape_cast %59 : vector<1x16x128xbf16> to vector<16x128xbf16>
    %61 = vector.extract_strided_slice %54 {offsets = [3, 0, 0], sizes = [1, 16, 128], strides = [1, 1, 1]} : vector<4x16x128xbf16> to vector<1x16x128xbf16>
    %62 = vector.shape_cast %61 : vector<1x16x128xbf16> to vector<16x128xbf16>
    %63 = tpu.concatenate %56, %58, %60, %62 in 1 : vector<16x128xbf16>, vector<16x128xbf16>, vector<16x128xbf16>, vector<16x128xbf16> -> vector<16x512xbf16>
    %c0_24 = arith.constant 0 : index
    %c0_25 = arith.constant 0 : index
    %64 = vector.load %arg6[%c0_24, %c0_25] : memref<512x128xbf16, #tpu.memory_space<vmem>>, vector<512x128xbf16>
    %cst_26 = arith.constant dense<0.000000e+00> : vector<16x128xf32>
    %65 = tpu.matmul %63, %64, %cst_26 {dimension_numbers = #tpu.dot_dimension_numbers<[1], [0], [0], [1], [0, 0, 1, 1], [], []>} : vector<16x512xbf16>, vector<512x128xbf16>, vector<16x128xf32> -> vector<16x128xf32>
    %c0_27 = arith.constant 0 : index
    %c0_28 = arith.constant 0 : index
    %66 = vector.load %arg7[%c0_27, %c0_28] : memref<1x128xf32, #tpu.memory_space<vmem>>, vector<1x128xf32>
    %67 = vector.broadcast %66 : vector<1x128xf32> to vector<16x128xf32>
    %68 = arith.addf %65, %67 : vector<16x128xf32>
    %69 = arith.truncf %68 : vector<16x128xf32> to vector<16x128xbf16>
    %70 = math.tanh %69 : vector<16x128xbf16>
    %c0_29 = arith.constant 0 : index
    %c0_30 = arith.constant 0 : index
    %71 = vector.load %arg8[%c0_29, %c0_30] : memref<128x128xbf16, #tpu.memory_space<vmem>>, vector<128x128xbf16>
    %cst_31 = arith.constant dense<0.000000e+00> : vector<16x128xf32>
    %72 = tpu.matmul %70, %71, %cst_31 {dimension_numbers = #tpu.dot_dimension_numbers<[1], [0], [0], [1], [0, 0, 1, 1], [], []>} : vector<16x128xbf16>, vector<128x128xbf16>, vector<16x128xf32> -> vector<16x128xf32>
    %c0_32 = arith.constant 0 : index
    %c0_33 = arith.constant 0 : index
    %73 = vector.load %arg9[%c0_32, %c0_33] : memref<1x128xf32, #tpu.memory_space<vmem>>, vector<1x128xf32>
    %74 = vector.broadcast %73 : vector<1x128xf32> to vector<16x128xf32>
    %75 = arith.addf %72, %74 : vector<16x128xf32>
    %76 = arith.truncf %75 : vector<16x128xf32> to vector<16x128xbf16>
    %77 = math.tanh %76 : vector<16x128xbf16>
    %c0_34 = arith.constant 0 : index
    %c0_35 = arith.constant 0 : index
    %78 = vector.load %arg10[%c0_34, %c0_35] : memref<128x128xbf16, #tpu.memory_space<vmem>>, vector<128x128xbf16>
    %cst_36 = arith.constant dense<0.000000e+00> : vector<16x128xf32>
    %79 = tpu.matmul %77, %78, %cst_36 {dimension_numbers = #tpu.dot_dimension_numbers<[1], [0], [0], [1], [0, 0, 1, 1], [], []>} : vector<16x128xbf16>, vector<128x128xbf16>, vector<16x128xf32> -> vector<16x128xf32>
    %c0_37 = arith.constant 0 : index
    %c0_38 = arith.constant 0 : index
    %80 = vector.load %arg11[%c0_37, %c0_38] : memref<1x128xf32, #tpu.memory_space<vmem>>, vector<1x128xf32>
    %81 = vector.broadcast %80 : vector<1x128xf32> to vector<16x128xf32>
    %82 = arith.addf %79, %81 : vector<16x128xf32>
    %c0_39 = arith.constant 0 : index
    %c0_40 = arith.constant 0 : index
    %83 = vector.load %arg12[%c0_39, %c0_40] : memref<16x128xf32, #tpu.memory_space<vmem>>, vector<16x128xf32>
    tpu.vector_store %arg12[%c0_39, %c0_40], %82 {strides = array<i32>} : memref<16x128xf32, #tpu.memory_space<vmem>>, vector<16x128xf32>,
    return
  }
  func.func @transform_0(%arg0: i32) -> (i32, i32, i32) {
    %c0_i32 = arith.constant 0 : i32
    %c0_i32_0 = arith.constant 0 : i32
    %c0_i32_1 = arith.constant 0 : i32
    return %c0_i32, %arg0, %c0_i32_0 : i32, i32, i32
  }
  func.func @transform_1(%arg0: i32) -> (i32, i32) {
    %c0_i32 = arith.constant 0 : i32
    %c0_i32_0 = arith.constant 0 : i32
    %c0_i32_1 = arith.constant 0 : i32
    return %c0_i32, %c0_i32_0 : i32, i32
  }
  func.func @transform_2(%arg0: i32) -> (i32, i32) {
    %c0_i32 = arith.constant 0 : i32
    %c0_i32_0 = arith.constant 0 : i32
    %c0_i32_1 = arith.constant 0 : i32
    return %c0_i32, %c0_i32_0 : i32, i32
  }
  func.func @transform_3(%arg0: i32) -> (i32, i32, i32) {
    %c0_i32 = arith.constant 0 : i32
    %c0_i32_0 = arith.constant 0 : i32
    %c0_i32_1 = arith.constant 0 : i32
    %c0_i32_2 = arith.constant 0 : i32
    return %c0_i32, %c0_i32_0, %c0_i32_1 : i32, i32, i32
  }
  func.func @transform_4(%arg0: i32) -> (i32, i32) {
    %c0_i32 = arith.constant 0 : i32
    %c0_i32_0 = arith.constant 0 : i32
    %c0_i32_1 = arith.constant 0 : i32
    return %c0_i32, %c0_i32_0 : i32, i32
  }
  func.func @transform_5(%arg0: i32) -> (i32, i32) {
    %c0_i32 = arith.constant 0 : i32
    %c0_i32_0 = arith.constant 0 : i32
    %c0_i32_1 = arith.constant 0 : i32
    return %c0_i32, %c0_i32_0 : i32, i32
  }
  func.func @transform_6(%arg0: i32) -> (i32, i32) {
    %c0_i32 = arith.constant 0 : i32
    %c0_i32_0 = arith.constant 0 : i32
    %c0_i32_1 = arith.constant 0 : i32
    return %c0_i32, %c0_i32_0 : i32, i32
  }
  func.func @transform_7(%arg0: i32) -> (i32, i32) {
    %c0_i32 = arith.constant 0 : i32
    %c0_i32_0 = arith.constant 0 : i32
    %c0_i32_1 = arith.constant 0 : i32
    return %c0_i32, %c0_i32_0 : i32, i32
  }
  func.func @transform_8(%arg0: i32) -> (i32, i32) {
    %c0_i32 = arith.constant 0 : i32
    %c0_i32_0 = arith.constant 0 : i32
    %c0_i32_1 = arith.constant 0 : i32
    return %c0_i32, %c0_i32_0 : i32, i32
  }
  func.func @transform_9(%arg0: i32) -> (i32, i32) {
    %c0_i32 = arith.constant 0 : i32
    %c0_i32_0 = arith.constant 0 : i32
    %c0_i32_1 = arith.constant 0 : i32
    return %c0_i32, %c0_i32_0 : i32, i32
  }
  func.func @transform_10(%arg0: i32) -> (i32, i32) {
    %c0_i32 = arith.constant 0 : i32
    %c0_i32_0 = arith.constant 0 : i32
    %c0_i32_1 = arith.constant 0 : i32
    return %c0_i32, %c0_i32_0 : i32, i32
  }
  func.func @transform_11(%arg0: i32) -> (i32, i32) {
    %c0_i32 = arith.constant 0 : i32
    %c0_i32_0 = arith.constant 0 : i32
    return %arg0, %c0_i32 : i32, i32
  }
}

</mosaic_0001>

<bundles_post_ra>
// kernel: tile.13
= control target key start
LH: loop header
LB: loop body
LE: loop exit
PB: predicated region body
PF: predicated region fallthrough
CT: control target
= control target key end

     0   :  { %s34_s0 = inlined_call_operand.vmem [shape: f32[6], index: 0, kind: input, shape index: {}]   ;;  %s35_s1 = inlined_call_operand.vmem [shape: f32[24,6], index: 1, kind: output, shape index: {}]  }
   0x1   :  { %v4_v0 = vld [vmem:[%s34_s0] ss:$0 sm:$0xff] }
   0x2   :  { %5 = vst [vmem:[%s35_s1] sm:$0xff] %v4_v0  ;;  %10 = vst [vmem:[%s35_s1 + $0x8] sm:$0xff] %v4_v0 }
   0x3   :  { %11 = vst [vmem:[%s35_s1 + $0x10] sm:$0xff] %v4_v0 }

// kernel: tile.14
= control target key start
LH: loop header
LB: loop body
LE: loop exit
PB: predicated region body
PF: predicated region fallthrough
CT: control target
= control target key end

     0   :  { %vm9_vm0 = vcmask 15360   ;;  %s211_s12 = smov 126   ;;  %s212_s13 = smov 114   ;;  %vm3_vm1 = vcmask 48128   ;;  %vm13_vm2 = vcmask 31744   ;;  %vm16_vm3 = vcmask 1048560   ;;  %s325_s0 = inlined_call_operand.vmem [shape: f32[24,6], index: 0, kind: input, shape index: {}]   ;;  %s326_s1 = inlined_call_operand.vmem [shape: f32[1,144], index: 1, kind: output, shape index: {}]  }
   0x1   :  { %v163_v0 = vld [vmem:[%s325_s0 + $0x15] sm:$0x1]   ;;  %v166_v3 = vld [vmem:[%s325_s0 + $0x13] sm:$0x1]   ;;  %v165_v4 = vld [vmem:[%s325_s0 + $0x14] sm:$0x1]  }
   0x2   :  { %v164_v1 = vld [vmem:[%s325_s0 + $0x15] sm:$0x1]   ;;  %26 = vrot.lane.b32.xlu1 %v166_v3, %s212_s13  ;;  %v167_v5 = vld [vmem:[%s325_s0 + $0x12] sm:$0x1]   ;;  %s213_s18 = smov 120   ;;  %s214_s19 = smov 108  }
   0x3   :  { %v10_v2 = vsel %vm9_vm0, %v164_v1, %v163_v0  ;;  %v168_v6 = vld [vmem:[%s325_s0 + $0x11] sm:$0x1]   ;;  %v169_v7 = vld [vmem:[%s325_s0 + $0x10] sm:$0x1]   ;;  %s215_s24 = smov 102   ;;  %s216_s25 = smov 96  }
   0x4   :  { %11 = vrot.lane.b32.xlu0 %v10_v2, %s211_s12  ;;  %v170_v8 = vld [vmem:[%s325_s0 + $0xf] sm:$0x1]   ;;  %v171_v9 = vld [vmem:[%s325_s0 + $0xe] sm:$0x1]   ;;  %v2_v10 = vld [vmem:[%s325_s0] sm:$0x1]  }
   0x5   :  { %4 = vst.msk [vmem:[#allocation0] sm:$0x1] %vm3_vm1, %v2_v10   ;;  %s217_s3 = smov 90   ;;  %s218_s4 = smov 84   ;;  %v172_v11 = vld [vmem:[%s325_s0 + $0xd] sm:$0x1]  }
   0x6   :  { %32 = vrot.lane.b32.xlu1 %v167_v5, %s214_s19  ;;  %v173_v12 = vld [vmem:[%s325_s0 + $0xc] sm:$0x1]   ;;  %s219_s9 = smov 78   ;;  %s220_s10 = smov 72   ;;  %v174_v13 = vld [vmem:[%s325_s0 + $0xb] sm:$0x1]  }
   0x7   :  { %v175_v14 = vld [vmem:[%s325_s0 + $0xa] sm:$0x1]   ;;  %s221_s15 = smov 66   ;;  %s222_s16 = smov 60   ;;  %v176_v15 = vld [vmem:[%s325_s0 + $0x9] sm:$0x1]  }
   0x8   :  { %20 = vrot.lane.b32.xlu0 %v165_v4, %s213_s18  ;;  %v177_v16 = vld [vmem:[%s325_s0 + $0x8] sm:$0x1]   ;;  %s223_s21 = smov 54   ;;  %s224_s22 = smov 48   ;;  %v178_v17 = vld [vmem:[%s325_s0 + $0x7] sm:$0x1]  }
   0x9   :  { %v179_v18 = vld [vmem:[%s325_s0 + $0x6] sm:$0x1]   ;;  %s225_s27 = smov 42   ;;  %s226_s28 = smov 36   ;;  %v180_v19 = vld [vmem:[%s325_s0 + $0x5] sm:$0x1]  }
   0xa   :  { %44 = vrot.lane.b32.xlu1 %v169_v7, %s216_s25  ;;  %v181_v20 = vld [vmem:[%s325_s0 + $0x4] sm:$0x1]   ;;  %s228_s5 = smov 24   ;;  %v182_v21 = vld [vmem:[%s325_s0 + $0x3] sm:$0x1]   ;;  %s230_s11 = smov 12  }
   0xb   :  { %v183_v22 = vld [vmem:[%s325_s0 + $0x2] sm:$0x1]   ;;  %v184_v23 = vld [vmem:[%s325_s0 + $0x17] sm:$0x1]   ;;  %v185_v24 = vld [vmem:[%s325_s0 + $0x1] sm:$0x1]  }
   0xc   :  { %38 = vrot.lane.b32.xlu0 %v168_v6, %s215_s24  ;;  %s232_s17 = smov 6   ;;  %v186_v25 = vld [vmem:[%s325_s0 + $0x16] sm:$0x1]   ;;  %s233_s0 = smov 4   ;;  %vm22_vm4 = vcmask 1032128   ;;  %vm28_vm5 = vcmask 982928  }
   0xd   :  { %vm34_vm6 = vcmask 933728   ;;  %vm40_vm7 = vcmask 884528   ;;  %vm46_vm8 = vcmask 835328   ;;  %vm52_vm9 = vcmask 786128  }
   0xe   :  { %56 = vrot.lane.b32.xlu1 %v171_v9, %s218_s4  ;;  %s227_s4 = smov 30   ;;  %vm58_vm10 = vcmask 736928   ;;  %vm64_vm11 = vcmask 687728   ;;  %vm70_vm12 = vcmask 638528   ;;  %vm76_vm13 = vcmask 589328  }
   0xf   :  { %vm82_vm14 = vcmask 540128   ;;  %vm88_vm15 = vcmask 490928   ;;  %vm94_vm0 = vcmask 441728   ;;  %vm100_vm1 = vcmask 392528  }
  0x10   :  { %50 = vrot.lane.b32.xlu0 %v170_v8, %s217_s3 }
  0x12   :  { %68 = vrot.lane.b32.xlu1 %v173_v12, %s220_s10  ;;  %s229_s10 = smov 18  }
  0x14   :  { %62 = vrot.lane.b32.xlu0 %v172_v11, %s219_s9 }
  0x16   :  { %80 = vrot.lane.b32.xlu1 %v175_v14, %s222_s16  ;;  %s231_s16 = smov 10  }
  0x18   :  { %74 = vrot.lane.b32.xlu0 %v174_v13, %s221_s15 }
  0x1a   :  { %92 = vrot.lane.b32.xlu1 %v177_v16, %s224_s22 }
  0x1c   :  { %86 = vrot.lane.b32.xlu0 %v176_v15, %s223_s21 }
  0x1e   :  { %104 = vrot.lane.b32.xlu1 %v179_v18, %s226_s28 }
  0x20   :  { %98 = vrot.lane.b32.xlu0 %v178_v17, %s225_s27 }
  0x22   :  { %116 = vrot.lane.b32.xlu1 %v181_v20, %s228_s5 }
  0x24   :  { %110 = vrot.lane.b32.xlu0 %v180_v19, %s227_s4 }
  0x26   :  { %128 = vrot.lane.b32.xlu1 %v183_v22, %s230_s11 }
  0x28   :  { %122 = vrot.lane.b32.xlu0 %v182_v21, %s229_s10 }
  0x2a   :  { %141 = vrot.lane.b32.xlu1 %v185_v24, %s232_s17 }
  0x2c   :  { %134 = vrot.lane.b32.xlu0 %v184_v23, %s231_s16 }
  0x30   :  { %147 = vrot.lane.b32.xlu0 %v186_v25, %s233_s0 }
  0x74   :  { %v27_v27 = vpop.permute.xlu1 %26  }
  0x76   :  { %v12_v26 = vpop.permute.xlu0 %11  }
  0x77   :  { %15 = vst.msk [vmem:[#allocation0 + $0x8] sm:$0x1] %vm13_vm2, %v12_v26   ;;  %vm106_vm2 = vcmask 343328  }
  0x78   :  { %17 = vst.msk [vmem:[#allocation0] sm:$0x1] %vm16_vm3, %v12_v26   ;;  %v33_v29 = vpop.permute.xlu1 %32   ;;  %vm112_vm3 = vcmask 294128  }
  0x7a   :  { %v21_v28 = vpop.permute.xlu0 %20  }
  0x7b   :  { %23 = vst.msk [vmem:[#allocation0] sm:$0x1] %vm22_vm4, %v21_v28   ;;  %vm118_vm4 = vcmask 244928  }
  0x7c   :  { %29 = vst.msk [vmem:[#allocation0] sm:$0x1] %vm28_vm5, %v27_v27   ;;  %v45_v31 = vpop.permute.xlu1 %44   ;;  %vm124_vm5 = vcmask 195728  }
  0x7d   :  { %35 = vst.msk [vmem:[#allocation0] sm:$0x1] %vm34_vm6, %v33_v29   ;;  %vm130_vm6 = vcmask 146528  }
  0x7e   :  { %v39_v30 = vpop.permute.xlu0 %38  }
  0x7f   :  { %41 = vst.msk [vmem:[#allocation0] sm:$0x1] %vm40_vm7, %v39_v30   ;;  %vm136_vm7 = vcmask 130128  }
  0x80   :  { %47 = vst.msk [vmem:[#allocation0] sm:$0x1] %vm46_vm8, %v45_v31   ;;  %v57_v33 = vpop.permute.xlu1 %56   ;;  %vm143_vm8 = vcmask 97328  }
  0x82   :  { %v51_v32 = vpop.permute.xlu0 %50  }
  0x83   :  { %53 = vst.msk [vmem:[#allocation0] sm:$0x1] %vm52_vm9, %v51_v32   ;;  %vm149_vm9 = vcmask 80928  }
  0x84   :  { %59 = vst.msk [vmem:[#allocation0] sm:$0x1] %vm58_vm10, %v57_v33   ;;  %v69_v35 = vpop.permute.xlu1 %68  }
  0x86   :  { %v63_v34 = vpop.permute.xlu0 %62  }
  0x87   :  { %65 = vst.msk [vmem:[#allocation0] sm:$0x1] %vm64_vm11, %v63_v34  }
  0x88   :  { %71 = vst.msk [vmem:[#allocation0] sm:$0x1] %vm70_vm12, %v69_v35   ;;  %v81_v37 = vpop.permute.xlu1 %80  }
  0x8a   :  { %v75_v36 = vpop.permute.xlu0 %74  }
  0x8b   :  { %77 = vst.msk [vmem:[#allocation0] sm:$0x1] %vm76_vm13, %v75_v36  }
  0x8c   :  { %83 = vst.msk [vmem:[#allocation0] sm:$0x1] %vm82_vm14, %v81_v37   ;;  %v93_v39 = vpop.permute.xlu1 %92  }
  0x8e   :  { %v87_v38 = vpop.permute.xlu0 %86  }
  0x8f   :  { %89 = vst.msk [vmem:[#allocation0] sm:$0x1] %vm88_vm15, %v87_v38  }
  0x90   :  { %95 = vst.msk [vmem:[#allocation0] sm:$0x1] %vm94_vm0, %v93_v39   ;;  %v105_v41 = vpop.permute.xlu1 %104  }
  0x92   :  { %v99_v40 = vpop.permute.xlu0 %98  }
  0x93   :  { %101 = vst.msk [vmem:[#allocation0] sm:$0x1] %vm100_vm1, %v99_v40  }
  0x94   :  { %107 = vst.msk [vmem:[#allocation0] sm:$0x1] %vm106_vm2, %v105_v41   ;;  %v117_v43 = vpop.permute.xlu1 %116  }
  0x96   :  { %v111_v42 = vpop.permute.xlu0 %110  }
  0x97   :  { %113 = vst.msk [vmem:[#allocation0] sm:$0x1] %vm112_vm3, %v111_v42  }
  0x98   :  { %119 = vst.msk [vmem:[#allocation0] sm:$0x1] %vm118_vm4, %v117_v43   ;;  %v129_v45 = vpop.permute.xlu1 %128  }
  0x9a   :  { %v123_v44 = vpop.permute.xlu0 %122  }
  0x9b   :  { %125 = vst.msk [vmem:[#allocation0] sm:$0x1] %vm124_vm5, %v123_v44  }
  0x9c   :  { %131 = vst.msk [vmem:[#allocation0] sm:$0x1] %vm130_vm6, %v129_v45   ;;  %v142_v47 = vpop.permute.xlu1 %141  }
  0x9d   :  { %144 = vst.msk [vmem:[#allocation0] sm:$0x1] %vm143_vm8, %v142_v47  }
  0x9e   :  { %v135_v46 = vpop.permute.xlu0 %134  }
  0x9f   :  { %138 = vst.msk [vmem:[#allocation0 + $0x8] sm:$0x1] %vm136_vm7, %v135_v46  }
  0xa2   :  { %v148_v48 = vpop.permute.xlu0 %147  }
  0xa3   :  { %151 = vst.msk [vmem:[#allocation0 + $0x8] sm:$0x1] %vm149_vm9, %v148_v48  }
  0xa4   :  { %v155_v49 = vld [vmem:[#allocation0] sm:$0x1] }
  0xa5   :  { %157 = vst [vmem:[%s326_s1] sm:$0x1] %v155_v49 }
  0xaa   :  { %v159_v50 = vld [vmem:[#allocation0 + $0x8] sm:$0x1] }
  0xab   :  { %187 = vst [vmem:[%s326_s1 + $0x1] sm:$0x1] %v159_v50 }

// kernel: tile.18
= control target key start
LH: loop header
LB: loop body
LE: loop exit
PB: predicated region body
PF: predicated region fallthrough
CT: control target
= control target key end

     0   :  { %s22_s0 = inlined_call_operand.vmem [shape: f32[16], index: 0, kind: input, shape index: {}]   ;;  %s23_s1 = inlined_call_operand.vmem [shape: f32[8,16], index: 1, kind: output, shape index: {}]  }
   0x1   :  { %v4_v0 = vld [vmem:[%s22_s0] ss:$0 sm:$0xff] }
   0x2   :  { %5 = vst [vmem:[%s23_s1] sm:$0xff] %v4_v0 }

// kernel: tile.19
= control target key start
LH: loop header
LB: loop body
LE: loop exit
PB: predicated region body
PF: predicated region fallthrough
CT: control target
= control target key end

     0   :  { %s67_s10 = smov 112   ;;  %s68_s11 = smov 80   ;;  %vm3_vm0 = vcmask 130048   ;;  %vm9_vm1 = vcmask 1048448   ;;  %vm15_vm2 = vcmask 917248   ;;  %vm21_vm3 = vcmask 786048   ;;  %s111_s0 = inlined_call_operand.vmem [shape: f32[8,16], index: 0, kind: input, shape index: {}]   ;;  %s112_s1 = inlined_call_operand.vmem [shape: f32[1,128], index: 1, kind: output, shape index: {}]  }
   0x1   :  { %v53_v0 = vld [vmem:[%s111_s0 + $0x7] sm:$0x1]   ;;  %v55_v1 = vld [vmem:[%s111_s0 + $0x5] sm:$0x1]   ;;  %v54_v2 = vld [vmem:[%s111_s0 + $0x6] sm:$0x1]  }
   0x2   :  { %7 = vrot.lane.b32.xlu0 %v53_v0, %s67_s10  ;;  %19 = vrot.lane.b32.xlu1 %v55_v1, %s68_s11  ;;  %v56_v3 = vld [vmem:[%s111_s0 + $0x4] sm:$0x1]   ;;  %v2_v4 = vld [vmem:[%s111_s0] sm:$0x1]   ;;  %s69_s18 = smov 96   ;;  %s70_s19 = smov 64  }
   0x3   :  { %4 = vst.msk [vmem:[#allocation0] sm:$0x1] %vm3_vm0, %v2_v4   ;;  %v57_v5 = vld [vmem:[%s111_s0 + $0x3] sm:$0x1]   ;;  %v58_v6 = vld [vmem:[%s111_s0 + $0x2] sm:$0x1]  }
   0x4   :  { %s71_s24 = smov 48   ;;  %s72_s25 = smov 32   ;;  %v59_v7 = vld [vmem:[%s111_s0 + $0x1] sm:$0x1]   ;;  %vm27_vm4 = vcmask 654848   ;;  %vm33_vm5 = vcmask 523648  }
   0x5   :  { %s73_s0 = smov 16   ;;  %vm39_vm6 = vcmask 392448   ;;  %vm45_vm7 = vcmask 261248  }
   0x6   :  { %13 = vrot.lane.b32.xlu0 %v54_v2, %s69_s18  ;;  %25 = vrot.lane.b32.xlu1 %v56_v3, %s70_s19 }
   0xa   :  { %31 = vrot.lane.b32.xlu0 %v57_v5, %s71_s24  ;;  %37 = vrot.lane.b32.xlu1 %v58_v6, %s72_s25 }
   0xe   :  { %43 = vrot.lane.b32.xlu0 %v59_v7, %s73_s0 }
  0x74   :  { %v8_v8 = vpop.permute.xlu0 %7   ;;  %v20_v9 = vpop.permute.xlu1 %19  }
  0x75   :  { %10 = vst.msk [vmem:[#allocation0] sm:$0x1] %vm9_vm1, %v8_v8  }
  0x78   :  { %v14_v10 = vpop.permute.xlu0 %13   ;;  %v26_v11 = vpop.permute.xlu1 %25  }
  0x79   :  { %16 = vst.msk [vmem:[#allocation0] sm:$0x1] %vm15_vm2, %v14_v10  }
  0x7a   :  { %22 = vst.msk [vmem:[#allocation0] sm:$0x1] %vm21_vm3, %v20_v9  }
  0x7b   :  { %28 = vst.msk [vmem:[#allocation0] sm:$0x1] %vm27_vm4, %v26_v11  }
  0x7c   :  { %v32_v12 = vpop.permute.xlu0 %31   ;;  %v38_v13 = vpop.permute.xlu1 %37  }
  0x7d   :  { %34 = vst.msk [vmem:[#allocation0] sm:$0x1] %vm33_vm5, %v32_v12  }
  0x7e   :  { %40 = vst.msk [vmem:[#allocation0] sm:$0x1] %vm39_vm6, %v38_v13  }
  0x80   :  { %v44_v14 = vpop.permute.xlu0 %43  }
  0x81   :  { %46 = vst.msk [vmem:[#allocation0] sm:$0x1] %vm45_vm7, %v44_v14  }
  0x88   :  { %v50_v15 = vld [vmem:[#allocation0] sm:$0x1] }
  0x89   :  { %52 = vst [vmem:[%s112_s1] sm:$0x1] %v50_v15 }

// kernel: lenet_forward.1
= control target key start
LH: loop header
LB: loop body
LE: loop exit
PB: predicated region body
PF: predicated region fallthrough
CT: control target
= control target key end

     0   :  { %vm421_vm0 = vcmask 97280   ;;  %vm494_vm1 = vcmask 1045504   ;;  %v3163_v47 = vmov 0   ;;  %vm985_vm2 = vcmask 130048   ;;  %s4310_s1 = inlined_call_operand.vmem [shape: bf16[140,144], index: 1, kind: input, shape index: {}]   ;;  %s4311_s0 = inlined_call_operand.vmem [shape: bf16[24,16,140], index: 0, kind: input, shape index: {}]   ;;  %s4312_s3 = inlined_call_operand.vmem [shape: bf16[5,144,128], index: 3, kind: input, shape index: {}]   ;;  %s4313_s2 = inlined_call_operand.vmem [shape: f32[1,144], index: 2, kind: input, shape index: {}]   ;;  %s4314_s5 = inlined_call_operand.vmem [shape: bf16[512,128], index: 5, kind: input, shape index: {}]   ;;  %s4315_s4 = inlined_call_operand.vmem [shape: f32[1,128], index: 4, kind: input, shape index: {}]   ;;  %s4316_s7 = inlined_call_operand.vmem [shape: bf16[128,128], index: 7, kind: input, shape index: {}]   ;;  %s4317_s9 = inlined_call_operand.vmem [shape: bf16[128,128], index: 9, kind: input, shape index: {}]   ;;  %s4318_s6 = inlined_call_operand.vmem [shape: f32[1,128], index: 6, kind: input, shape index: {}]   ;;  %s4319_s8 = inlined_call_operand.vmem [shape: f32[1,128], index: 8, kind: input, shape index: {}]   ;;  %s4320_s10 = inlined_call_operand.vmem [shape: f32[1,128], index: 10, kind: input, shape index: {}]   ;;  %s4321_s11 = inlined_call_operand.vmem [shape: f32[16,128], index: 11, kind: output, shape index: {}]  }
   0x1   :  { %v2855_v0 = vld [vmem:[%s4310_s1 + $0x4] ss:$8 sps:$4 sm:$0xff]   ;;  %v2857_v1 = vld [vmem:[%s4310_s1] ss:$8 sps:$4 sm:$0xff]   ;;  %v2858_v2 = vld [vmem:[%s4310_s1 + $0x14] ss:$8 sps:$4 sm:$0xff]   ;;  %1010 = vmatprep.subr.bf16.mxu1 %v3163_v47 }
   0x2   :  { %501 = vmatprep.subr.bf16.mxu0 %v2855_v0  ;;  %v2860_v3 = vld [vmem:[%s4310_s1 + $0x10] ss:$8 sps:$4 sm:$0xff]   ;;  %v2861_v4 = vld [vmem:[%s4310_s1 + $0x24] ss:$8 sps:$4 sm:$0xff]   ;;  %v2863_v5 = vld [vmem:[%s4310_s1 + $0x20] ss:$8 sps:$4 sm:$0xff]  }
   0x3   :  { %502 = vmatpush1.bf16.msra.mxu0 %v2857_v1  ;;  %v2864_v6 = vld [vmem:[%s4310_s1 + $0x34] ss:$8 sps:$4 sm:$0xff]   ;;  %v2866_v7 = vld [vmem:[%s4310_s1 + $0x30] ss:$8 sps:$4 sm:$0xff]   ;;  %v2867_v8 = vld [vmem:[%s4310_s1 + $0x44] ss:$8 sps:$4 sm:$0xff]  }
   0x4   :  { %503 = vmatprep.subr.bf16.mxu0 %v2858_v2  ;;  %v2884_v9 = vld [vmem:[%s4311_s0 + $0x4] ss:$8 sps:$4 sm:$0xff]   ;;  %v2869_v10 = vld [vmem:[%s4310_s1 + $0x40] ss:$8 sps:$4 sm:$0xff]   ;;  %v2870_v11 = vld [vmem:[%s4310_s1 + $0x54] ss:$8 sps:$4 sm:$0xff]  }
   0x5   :  { %2517 = vmatprep.mubr.msk.bf16.mxu0 %vm421_vm0, %v2884_v9  ;;  %v2872_v12 = vld [vmem:[%s4310_s1 + $0x50] ss:$8 sps:$4 sm:$0xff]   ;;  %v2873_v13 = vld [vmem:[%s4310_s1 + $0x64] ss:$8 sps:$4 sm:$0xff]   ;;  %v2875_v14 = vld [vmem:[%s4310_s1 + $0x60] ss:$8 sps:$4 sm:$0xff]  }
   0x6   :  { %v2876_v15 = vld [vmem:[%s4310_s1 + $0x74] ss:$8 sps:$4 sm:$0xff]   ;;  %v2878_v16 = vld [vmem:[%s4310_s1 + $0x70] ss:$8 sps:$4 sm:$0xff]   ;;  %v2882_v20 = vld [vmem:[%s4311_s0] ss:$8 sps:$4 sm:$0xff]  }
   0x7   :  { %504 = vmatpush1.bf16.msra.mxu0 %v2860_v3  ;;  %v2879_v17 = vld [vmem:[%s4310_s1 + $0x84] ss:$8 sps:$4 sm:$0x3f]   ;;  %v2881_v18 = vld [vmem:[%s4310_s1 + $0x80] ss:$8 sps:$4 sm:$0x3f]  }
   0x8   :  { %505 = vmatprep.subr.bf16.mxu0 %v2861_v4  ;;  %v496_v19 = vsel %vm494_vm1, %v2881_v18, 0  ;;  %v2885_v21 = vld [vmem:[%s4311_s0 + $0x14] ss:$8 sps:$4 sm:$0xff]   ;;  %v2887_v22 = vld [vmem:[%s4311_s0 + $0x10] ss:$8 sps:$4 sm:$0xff]   ;;  %v2936_v46 = vld [vmem:[%s4312_s3 + $0x48] sm:$0xff]  }
   0x9   :  { %v2888_v23 = vld [vmem:[%s4311_s0 + $0x24] ss:$8 sps:$4 sm:$0xff]   ;;  %v2890_v24 = vld [vmem:[%s4311_s0 + $0x20] ss:$8 sps:$4 sm:$0xff]   ;;  %v2891_v25 = vld [vmem:[%s4311_s0 + $0x34] ss:$8 sps:$4 sm:$0xff]   ;;  %1011 = vmatpush1.bf16.msra.mxu1 %v2936_v46 }
   0xa   :  { %v2893_v26 = vld [vmem:[%s4311_s0 + $0x30] ss:$8 sps:$4 sm:$0xff]   ;;  %v2894_v27 = vld [vmem:[%s4311_s0 + $0x44] ss:$8 sps:$4 sm:$0xff]   ;;  %v2896_v28 = vld [vmem:[%s4311_s0 + $0x40] ss:$8 sps:$4 sm:$0xff]   ;;  %1012 = vmatprep.subr.bf16.mxu1 %v3163_v47 }
   0xb   :  { %506 = vmatpush1.bf16.msra.mxu0 %v2863_v5  ;;  %v2897_v29 = vld [vmem:[%s4311_s0 + $0x54] ss:$8 sps:$4 sm:$0xff]   ;;  %v2899_v30 = vld [vmem:[%s4311_s0 + $0x50] ss:$8 sps:$4 sm:$0xff]   ;;  %v2900_v31 = vld [vmem:[%s4311_s0 + $0x64] ss:$8 sps:$4 sm:$0xff]  }
   0xc   :  { %507 = vmatprep.subr.bf16.mxu0 %v2864_v6  ;;  %v2902_v32 = vld [vmem:[%s4311_s0 + $0x60] ss:$8 sps:$4 sm:$0xff]   ;;  %v2903_v33 = vld [vmem:[%s4311_s0 + $0x74] ss:$8 sps:$4 sm:$0xff]   ;;  %v2905_v34 = vld [vmem:[%s4311_s0 + $0x70] ss:$8 sps:$4 sm:$0xff]  }
   0xd   :  { %v2906_v35 = vld [vmem:[%s4311_s0 + $0x84] ss:$8 sps:$4 sm:$0xff]   ;;  %v2908_v36 = vld [vmem:[%s4311_s0 + $0x80] ss:$8 sps:$4 sm:$0xff]   ;;  %v2909_v37 = vld [vmem:[%s4311_s0 + $0x94] ss:$8 sps:$4 sm:$0xff]  }
   0xe   :  { %v2911_v38 = vld [vmem:[%s4311_s0 + $0x90] ss:$8 sps:$4 sm:$0xff]   ;;  %v2912_v39 = vld [vmem:[%s4311_s0 + $0xa4] ss:$8 sps:$4 sm:$0xff]   ;;  %v2914_v40 = vld [vmem:[%s4311_s0 + $0xa0] ss:$8 sps:$4 sm:$0xff]  }
   0xf   :  { %508 = vmatpush1.bf16.msra.mxu0 %v2866_v7  ;;  %v2915_v41 = vld [vmem:[%s4311_s0 + $0xb4] ss:$8 sps:$4 sm:$0xff]   ;;  %v2917_v42 = vld [vmem:[%s4311_s0 + $0xb0] ss:$8 sps:$4 sm:$0xff]   ;;  %v2918_v43 = vld [vmem:[%s4311_s0 + $0xc4] ss:$8 sps:$4 sm:$0xff]  }
  0x10   :  { %509 = vmatprep.subr.bf16.mxu0 %v2867_v8  ;;  %v2920_v44 = vld [vmem:[%s4311_s0 + $0xc0] ss:$8 sps:$4 sm:$0xff]   ;;  %v2921_v45 = vld [vmem:[%s4311_s0 + $0xd4] ss:$8 sps:$4 sm:$0xff]   ;;  %v2923_v49 = vld [vmem:[%s4311_s0 + $0xd0] ss:$8 sps:$4 sm:$0xff]  }
  0x11   :  { %v2937_v48 = vld [vmem:[%s4312_s3 + $0x50] sm:$0xff]   ;;  %v2924_v50 = vld [vmem:[%s4311_s0 + $0xe4] ss:$8 sps:$4 sm:$0xff]   ;;  %v2938_v51 = vld [vmem:[%s4312_s3 + $0x58] sm:$0xff]   ;;  %vm3165_vm3 = vmmov 0  }
  0x12   :  { %1013 = vmatpush1.bf16.msra.mxu1 %v2937_v48  ;;  %v2939_v52 = vld [vmem:[%s4312_s3 + $0x60] sm:$0xff]   ;;  %v2927_v54 = vld [vmem:[%s4311_s0 + $0xf4] ss:$8 sps:$4 sm:$0xff]   ;;  %v2940_v55 = vld [vmem:[%s4312_s3 + $0x68] sm:$0xff]  }
  0x13   :  { %510 = vmatpush1.bf16.msra.mxu0 %v2869_v10  ;;  %1014 = vmatprep.subr.bf16.mxu1 %v3163_v47  ;;  %v2926_v53 = vld [vmem:[%s4311_s0 + $0xe0] ss:$8 sps:$4 sm:$0xff]   ;;  %v2944_v56 = vld [vmem:[%s4312_s3 + $0x70] sm:$0xff]   ;;  %v2930_v58 = vld [vmem:[%s4311_s0 + $0x104] ss:$8 sps:$4 sm:$0xff]  }
  0x14   :  { %511 = vmatprep.subr.bf16.mxu0 %v2870_v11  ;;  %v2929_v57 = vld [vmem:[%s4311_s0 + $0xf0] ss:$8 sps:$4 sm:$0xff]   ;;  %v2949_v60 = vld [vmem:[%s4312_s3 + $0x80] sm:$0xff]   ;;  %v2933_v62 = vld [vmem:[%s4311_s0 + $0x114] ss:$8 sps:$4 sm:$0xff]  }
  0x15   :  { %v2945_v59 = vld [vmem:[%s4312_s3 + $0x78] sm:$0xff]   ;;  %v2932_v61 = vld [vmem:[%s4311_s0 + $0x100] ss:$8 sps:$4 sm:$0xff]   ;;  %v2941_v3 = vld [vmem:[%s4311_s0 + $0x124] ss:$8 sps:$4 sm:$0xff]  }
  0x16   :  { %1015 = vmatpush1.bf16.msra.mxu1 %v2938_v51  ;;  %v2950_v63 = vld [vmem:[%s4312_s3 + $0x88] sm:$0xff]   ;;  %v2951_v0 = vld [vmem:[%s4312_s3 + $0xd8] sm:$0xff]   ;;  %v2955_v1 = vld [vmem:[%s4312_s3 + $0xe0] sm:$0xff]  }
  0x17   :  { %512 = vmatpush1.bf16.msra.mxu0 %v2872_v12  ;;  %1016 = vmatprep.subr.bf16.mxu1 %v3163_v47  ;;  %v2935_v2 = vld [vmem:[%s4311_s0 + $0x110] ss:$8 sps:$4 sm:$0xff]   ;;  %v2956_v4 = vld [vmem:[%s4312_s3 + $0xe8] sm:$0xff]   ;;  %v2946_v7 = vld [vmem:[%s4311_s0 + $0x134] ss:$8 sps:$4 sm:$0xff]  }
  0x18   :  { %513 = vmatprep.subr.bf16.mxu0 %v2873_v13  ;;  %v2960_v5 = vld [vmem:[%s4312_s3 + $0xf0] sm:$0xff]   ;;  %v2943_v6 = vld [vmem:[%s4311_s0 + $0x120] ss:$8 sps:$4 sm:$0xff]   ;;  %v2961_v8 = vld [vmem:[%s4312_s3 + $0xf8] sm:$0xff]  }
  0x19   :  { %v2965_v9 = vld [vmem:[%s4312_s3 + $0x100] sm:$0xff]   ;;  %v2948_v10 = vld [vmem:[%s4311_s0 + $0x130] ss:$8 sps:$4 sm:$0xff]   ;;  %v2966_v12 = vld [vmem:[%s4312_s3 + $0x108] sm:$0xff]  }
  0x1a   :  { %1017 = vmatpush1.bf16.msra.mxu1 %v2939_v52  ;;  %v2952_v11 = vld [vmem:[%s4311_s0 + $0x144] ss:$8 sps:$4 sm:$0xff]   ;;  %v2970_v13 = vld [vmem:[%s4312_s3 + $0x110] sm:$0xff]  }
  0x1b   :  { %514 = vmatpush1.bf16.msra.mxu0 %v2875_v14  ;;  %1018 = vmatprep.subr.bf16.mxu1 %v3163_v47  ;;  %v2954_v14 = vld [vmem:[%s4311_s0 + $0x140] ss:$8 sps:$4 sm:$0xff]   ;;  %v2962_v18 = vld [vmem:[%s4311_s0 + $0x164] ss:$8 sps:$4 sm:$0xff]  }
  0x1c   :  { %515 = vmatprep.subr.bf16.mxu0 %v2876_v15  ;;  %v2957_v15 = vld [vmem:[%s4311_s0 + $0x154] ss:$8 sps:$4 sm:$0xff]  }
  0x1e   :  { %1019 = vmatpush1.bf16.msra.mxu1 %v2940_v55 }
  0x1f   :  { %516 = vmatpush1.bf16.msra.mxu0 %v2878_v16  ;;  %1020 = vmatprep.subr.bf16.mxu1 %v3163_v47  ;;  %v2971_v16 = vld [vmem:[%s4312_s3 + $0x118] sm:$0xff]  }
  0x20   :  { %2516 = vmatprep.subr.msk.bf16.mxu0 %vm494_vm1, %v2879_v17  ;;  %v2959_v17 = vld [vmem:[%s4311_s0 + $0x150] ss:$8 sps:$4 sm:$0xff]  }
  0x22   :  { %1021 = vmatpush1.bf16.msra.mxu1 %v2944_v56 }
  0x23   :  { %518 = vmatpush1.bf16.msra.mxu0 %v496_v19  ;;  %1022 = vmatprep.subr.bf16.mxu1 %v3163_v47  ;;  %v2964_v19 = vld [vmem:[%s4311_s0 + $0x160] ss:$8 sps:$4 sm:$0xff]  }
  0x24   :  { %1526 = vmatprep.subr.bf16.mxu0 %v3163_v47 }
  0x26   :  { %534 = vmatmul.mubr.bf16.vlgmr.msra.gmra.mrb[0].mxu0 %v2882_v20  ;;  %1023 = vmatpush1.bf16.msra.mxu1 %v2945_v59  ;;  %v2967_v20 = vld [vmem:[%s4311_s0 + $0x174] ss:$8 sps:$4 sm:$0xff]  }
  0x27   :  { %2518 = vmatprep.mubr.msk.bf16.mxu0 %vm421_vm0, %v2885_v21  ;;  %1024 = vmatprep.subr.bf16.mxu1 %v3163_v47  ;;  %v2969_v21 = vld [vmem:[%s4311_s0 + $0x170] ss:$8 sps:$4 sm:$0xff]  }
  0x28   :  { %1527 = vmatpush1.bf16.msra.mxu0 %v2951_v0 }
  0x29   :  { %1528 = vmatprep.subr.bf16.mxu0 %v3163_v47 }
  0x2a   :  { %1025 = vmatpush1.bf16.msra.mxu1 %v2949_v60 }
  0x2b   :  { %1026 = vmatprep.subr.bf16.mxu1 %v3163_v47 }
  0x2c   :  { %1529 = vmatpush1.bf16.msra.mxu0 %v2955_v1 }
  0x2d   :  { %1530 = vmatprep.subr.bf16.mxu0 %v3163_v47 }
  0x2e   :  { %544 = vmatmul.mubr.bf16.gmra.mrb[4].mxu0 %v2887_v22  ;;  %1027 = vmatpush1.bf16.msra.mxu1 %v2950_v63  ;;  %v107_v22 = vlaneseq }
  0x2f   :  { %2519 = vmatprep.mubr.msk.bf16.mxu0 %vm421_vm0, %v2888_v23  ;;  %1164 = vmatprep.subr.bf16.mxu1 %v3163_v47 }
  0x30   :  { %1531 = vmatpush1.bf16.msra.mxu0 %v2956_v4  ;;  %v108_v23 = vshrl.u32 %v107_v22, 7 }
  0x31   :  { %1532 = vmatprep.subr.bf16.mxu0 %v3163_v47 }
  0x34   :  { %1533 = vmatpush1.bf16.msra.mxu0 %v2960_v5 }
  0x35   :  { %1534 = vmatprep.subr.bf16.mxu0 %v3163_v47 }
  0x36   :  { %554 = vmatmul.mubr.bf16.gmra.mrb[8].mxu0 %v2890_v24  ;;  %v109_v24 = vsub.s32 0, %v108_v23 }
  0x37   :  { %2520 = vmatprep.mubr.msk.bf16.mxu0 %vm421_vm0, %v2891_v25  ;;  %v105_v25 = vld [vmem:[%s4313_s2] sm:$0x3] }
  0x38   :  { %1535 = vmatpush1.bf16.msra.mxu0 %v2961_v8 }
  0x39   :  { %1536 = vmatprep.subr.bf16.mxu0 %v3163_v47 }
  0x3c   :  { %1537 = vmatpush1.bf16.msra.mxu0 %v2965_v9 }
  0x3d   :  { %1538 = vmatprep.subr.bf16.mxu0 %v3163_v47 }
  0x3e   :  { %564 = vmatmul.mubr.bf16.gmra.mrb[12].mxu0 %v2893_v26  ;;  %v113_v26 = vsub.s32 1, %v108_v23 }
  0x3f   :  { %2521 = vmatprep.mubr.msk.bf16.mxu0 %vm421_vm0, %v2894_v27  ;;  %v3524_v27 = vrot.slane %v105_v25, %v109_v24 }
  0x40   :  { %1539 = vmatpush1.bf16.msra.mxu0 %v2966_v12 }
  0x41   :  { %1540 = vmatprep.subr.bf16.mxu0 %v3163_v47 }
  0x44   :  { %1541 = vmatpush1.bf16.msra.mxu0 %v2970_v13 }
  0x45   :  { %1542 = vmatprep.subr.bf16.mxu0 %v3163_v47 }
  0x46   :  { %574 = vmatmul.mubr.bf16.gmra.mrb[16].mxu0 %v2896_v28 }
  0x47   :  { %2522 = vmatprep.mubr.msk.bf16.mxu0 %vm421_vm0, %v2897_v29  ;;  %v3526_v29 = vrot.slane %v105_v25, %v113_v26 }
  0x48   :  { %1543 = vmatpush1.bf16.msra.mxu0 %v2971_v16 }
  0x4e   :  { %584 = vmatmul.mubr.bf16.gmra.mrb[20].mxu0 %v2899_v30 }
  0x4f   :  { %2523 = vmatprep.mubr.msk.bf16.mxu0 %vm421_vm0, %v2900_v31 }
  0x56   :  { %594 = vmatmul.mubr.bf16.gmra.mrb[24].mxu0 %v2902_v32 }
  0x57   :  { %2524 = vmatprep.mubr.msk.bf16.mxu0 %vm421_vm0, %v2903_v33 }
  0x5e   :  { %604 = vmatmul.mubr.bf16.gmra.mrb[28].mxu0 %v2905_v34 }
  0x5f   :  { %2525 = vmatprep.mubr.msk.bf16.mxu0 %vm421_vm0, %v2906_v35 }
  0x66   :  { %614 = vmatmul.mubr.bf16.gmra.mrb[32].mxu0 %v2908_v36 }
  0x67   :  { %2526 = vmatprep.mubr.msk.bf16.mxu0 %vm421_vm0, %v2909_v37 }
  0x6e   :  { %624 = vmatmul.mubr.bf16.gmra.mrb[36].mxu0 %v2911_v38 }
  0x6f   :  { %2527 = vmatprep.mubr.msk.bf16.mxu0 %vm421_vm0, %v2912_v39 }
  0x76   :  { %634 = vmatmul.mubr.bf16.gmra.mrb[40].mxu0 %v2914_v40 }
  0x77   :  { %2528 = vmatprep.mubr.msk.bf16.mxu0 %vm421_vm0, %v2915_v41 }
  0x7e   :  { %644 = vmatmul.mubr.bf16.gmra.mrb[44].mxu0 %v2917_v42 }
  0x7f   :  { %2529 = vmatprep.mubr.msk.bf16.mxu0 %vm421_vm0, %v2918_v43 }
  0x86   :  { %654 = vmatmul.mubr.bf16.gmra.mrb[48].mxu0 %v2920_v44 }
  0x87   :  { %2530 = vmatprep.mubr.msk.bf16.mxu0 %vm421_vm0, %v2921_v45 }
  0x8e   :  { %664 = vmatmul.mubr.bf16.gmra.mrb[52].mxu0 %v2923_v49 }
  0x8f   :  { %2531 = vmatprep.mubr.msk.bf16.mxu0 %vm421_vm0, %v2924_v50 }
  0x96   :  { %674 = vmatmul.mubr.bf16.gmra.mrb[56].mxu0 %v2926_v53 }
  0x97   :  { %2532 = vmatprep.mubr.msk.bf16.mxu0 %vm421_vm0, %v2927_v54 }
  0x9e   :  { %684 = vmatmul.mubr.bf16.gmra.mrb[60].mxu0 %v2929_v57 }
  0x9f   :  { %2533 = vmatprep.mubr.msk.bf16.mxu0 %vm421_vm0, %v2930_v58 }
  0xa6   :  { %694 = vmatmul.mubr.bf16.gmra.mrb[64].mxu0 %v2932_v61 }
  0xa7   :  { %2534 = vmatprep.mubr.msk.bf16.mxu0 %vm421_vm0, %v2933_v62 }
  0xae   :  { %704 = vmatmul.mubr.bf16.gmra.mrb[68].mxu0 %v2935_v2 }
  0xaf   :  { %2535 = vmatprep.mubr.msk.bf16.mxu0 %vm421_vm0, %v2941_v3 }
  0xb6   :  { %714 = vmatmul.mubr.bf16.gmra.mrb[72].mxu0 %v2943_v6 }
  0xb7   :  { %2536 = vmatprep.mubr.msk.bf16.mxu0 %vm421_vm0, %v2946_v7 }
  0xbe   :  { %724 = vmatmul.mubr.bf16.gmra.mrb[76].mxu0 %v2948_v10 }
  0xbf   :  { %2537 = vmatprep.mubr.msk.bf16.mxu0 %vm421_vm0, %v2952_v11 }
  0xc6   :  { %734 = vmatmul.mubr.bf16.gmra.mrb[80].mxu0 %v2954_v14 }
  0xc7   :  { %2538 = vmatprep.mubr.msk.bf16.mxu0 %vm421_vm0, %v2957_v15 }
  0xce   :  { %744 = vmatmul.mubr.bf16.gmra.mrb[84].mxu0 %v2959_v17 }
  0xcf   :  { %2539 = vmatprep.mubr.msk.bf16.mxu0 %vm421_vm0, %v2962_v18 }
  0xd6   :  { %754 = vmatmul.mubr.bf16.gmra.mrb[88].mxu0 %v2964_v19 }
  0xd7   :  { %2540 = vmatprep.mubr.msk.bf16.mxu0 %vm421_vm0, %v2967_v20 }
  0xde   :  { %764 = vmatmul.mubr.bf16.gmra.mrb[92].mxu0 %v2969_v21 }
  0xf9   :  { %v535_v28 = vpop.f32.mrb[0].mxu0 }
  0xfa   :  { %v537_v30 = vpop.f32.mrb[1].mxu0  ;;  %v536_v32 = vadd.f32 %v535_v28, %v3524_v27 }
  0xfb   :  { %v539_v31 = vpop.f32.mrb[2].mxu0  ;;  %v538_v35 = vadd.f32 %v537_v30, %v3526_v29 }
  0xfc   :  { %v540_v33 = vadd.f32 %v539_v31, %v3524_v27  ;;  %v541_v34 = vpop.f32.mrb[3].mxu0 }
  0xfd   :  { %v542_v36 = vadd.f32 %v541_v34, %v3526_v29 }
  0xfe   :  { %v774_v37 = vpack.c.bf16 %v540_v33, %v536_v32 }
  0xff   :  { %v775_v38 = vpack.c.bf16 %v542_v36, %v538_v35 }
 0x100   :  { %3047 = vtanh.bf16 %v774_v37 }
 0x101   :  { %v545_v39 = vpop.f32.mrb[4].mxu0  ;;  %3049 = vtanh.bf16 %v775_v38  ;;  %v2972_v38 = vld [vmem:[%s4312_s3] sm:$0xff]  }
 0x102   :  { %v547_v40 = vpop.f32.mrb[5].mxu0  ;;  %v546_v42 = vadd.f32 %v545_v39, %v3524_v27 }
 0x103   :  { %v549_v41 = vpop.f32.mrb[6].mxu0  ;;  %v548_v45 = vadd.f32 %v547_v40, %v3526_v29 }
 0x104   :  { %v550_v43 = vadd.f32 %v549_v41, %v3524_v27  ;;  %v551_v44 = vpop.f32.mrb[7].mxu0 }
 0x105   :  { %v552_v46 = vadd.f32 %v551_v44, %v3526_v29 }
 0x106   :  { %v776_v48 = vpack.c.bf16 %v550_v43, %v546_v42  ;;  %v2973_v42 = vld [vmem:[%s4312_s3 + $0x8] sm:$0xff]  }
 0x107   :  { %v777_v49 = vpack.c.bf16 %v552_v46, %v548_v45 }
 0x108   :  { %3051 = vtanh.bf16 %v776_v48 }
 0x109   :  { %3053 = vtanh.bf16 %v777_v49  ;;  %v555_v50 = vpop.f32.mrb[8].mxu0 }
 0x10a   :  { %v557_v51 = vpop.f32.mrb[9].mxu0  ;;  %v556_v53 = vadd.f32 %v555_v50, %v3524_v27 }
 0x10b   :  { %v559_v52 = vpop.f32.mrb[10].mxu0  ;;  %v558_v56 = vadd.f32 %v557_v51, %v3526_v29  ;;  %v3540_v60 = vpop.eup %3047  ;;  %v2974_v51 = vld [vmem:[%s4312_s3 + $0x10] sm:$0xff]  }
 0x10c   :  { %v560_v54 = vadd.f32 %v559_v52, %v3524_v27  ;;  %v561_v55 = vpop.f32.mrb[11].mxu0  ;;  %v3542_v62 = vpop.eup %3049 }
 0x10d   :  { %v562_v57 = vadd.f32 %v561_v55, %v3526_v29 }
 0x10e   :  { %v778_v58 = vpack.c.bf16 %v560_v54, %v556_v53 }
 0x10f   :  { %v779_v59 = vpack.c.bf16 %v562_v57, %v558_v56  ;;  %v2975_v56 = vld [vmem:[%s4312_s3 + $0x18] sm:$0xff]  }
 0x110   :  { %3055 = vtanh.bf16 %v778_v58 }
 0x111   :  { %v565_v61 = vpop.f32.mrb[12].mxu0  ;;  %3057 = vtanh.bf16 %v779_v59 }
 0x112   :  { %v567_v63 = vpop.f32.mrb[13].mxu0  ;;  %v566_v3 = vadd.f32 %v565_v61, %v3524_v27 }
 0x113   :  { %v3544_v0 = vpop.eup %3051  ;;  %v569_v1 = vpop.f32.mrb[14].mxu0  ;;  %v568_v7 = vadd.f32 %v567_v63, %v3526_v29 }
 0x114   :  { %v3546_v2 = vpop.eup %3053  ;;  %v570_v4 = vadd.f32 %v569_v1, %v3524_v27  ;;  %v571_v5 = vpop.f32.mrb[15].mxu0  ;;  %v870_v6 = vadd.bf16 %v3544_v0, %v3540_v60 }
 0x115   :  { %v572_v8 = vadd.f32 %v571_v5, %v3526_v29  ;;  %v871_v9 = vadd.bf16 %v3546_v2, %v3542_v62 }
 0x116   :  { %v780_v10 = vpack.c.bf16 %v570_v4, %v566_v3 }
 0x117   :  { %v781_v11 = vpack.c.bf16 %v572_v8, %v568_v7 }
 0x118   :  { %3059 = vtanh.bf16 %v780_v10 }
 0x119   :  { %3061 = vtanh.bf16 %v781_v11  ;;  %v575_v12 = vpop.f32.mrb[16].mxu0  ;;  %v2976_v11 = vld [vmem:[%s4312_s3 + $0x20] sm:$0xff]  }
 0x11a   :  { %v577_v13 = vpop.f32.mrb[17].mxu0  ;;  %v576_v15 = vadd.f32 %v575_v12, %v3524_v27 }
 0x11b   :  { %v579_v14 = vpop.f32.mrb[18].mxu0  ;;  %v578_v18 = vadd.f32 %v577_v13, %v3526_v29  ;;  %v3056_v22 = vpop.eup %3055 }
 0x11c   :  { %v580_v16 = vadd.f32 %v579_v14, %v3524_v27  ;;  %v581_v17 = vpop.f32.mrb[19].mxu0  ;;  %v3058_v24 = vpop.eup %3057 }
 0x11d   :  { %v582_v19 = vadd.f32 %v581_v17, %v3526_v29 }
 0x11e   :  { %v782_v20 = vpack.c.bf16 %v580_v16, %v576_v15  ;;  %v2977_v15 = vld [vmem:[%s4312_s3 + $0x28] sm:$0xff]  }
 0x11f   :  { %v783_v21 = vpack.c.bf16 %v582_v19, %v578_v18 }
 0x120   :  { %3063 = vtanh.bf16 %v782_v20 }
 0x121   :  { %v585_v23 = vpop.f32.mrb[20].mxu0  ;;  %3065 = vtanh.bf16 %v783_v21 }
 0x122   :  { %v587_v25 = vpop.f32.mrb[21].mxu0  ;;  %v586_v31 = vadd.f32 %v585_v23, %v3524_v27  ;;  %v2978_v23 = vld [vmem:[%s4312_s3 + $0x30] sm:$0xff]  }
 0x123   :  { %v3060_v26 = vpop.eup %3059  ;;  %v589_v28 = vpop.f32.mrb[22].mxu0  ;;  %v588_v35 = vadd.f32 %v587_v25, %v3526_v29 }
 0x124   :  { %v3062_v30 = vpop.eup %3061  ;;  %v590_v32 = vadd.f32 %v589_v28, %v3524_v27  ;;  %v591_v33 = vpop.f32.mrb[23].mxu0  ;;  %v3562_v34 = vadd.bf16 %v3060_v26, %v3056_v22 }
 0x125   :  { %v592_v36 = vadd.f32 %v591_v33, %v3526_v29  ;;  %v3566_v37 = vadd.bf16 %v3062_v30, %v3058_v24  ;;  %v2979_v30 = vld [vmem:[%s4312_s3 + $0x38] sm:$0xff]  }
 0x126   :  { %v784_v39 = vpack.c.bf16 %v590_v32, %v586_v31 }
 0x127   :  { %v785_v40 = vpack.c.bf16 %v592_v36, %v588_v35  ;;  %2568 = vmatprep.mubr.msk.bf16.mxu1 %vm985_vm2, %v3566_v37 }
 0x128   :  { %3067 = vtanh.bf16 %v784_v39  ;;  %1043 = vmatmul.mubr.bf16.vlgmr.msra.gmra.mrb[0].mxu1 %v3562_v34 }
 0x129   :  { %3069 = vtanh.bf16 %v785_v40  ;;  %v595_v41 = vpop.f32.mrb[24].mxu0  ;;  %1165 = vmatpush1.bf16.msra.mxu1 %v2972_v38 }
 0x12a   :  { %v597_v43 = vpop.f32.mrb[25].mxu0  ;;  %1166 = vmatprep.subr.bf16.mxu1 %v3163_v47  ;;  %v596_v45 = vadd.f32 %v595_v41, %v3524_v27 }
 0x12b   :  { %v599_v44 = vpop.f32.mrb[26].mxu0  ;;  %v598_v49 = vadd.f32 %v597_v43, %v3526_v29  ;;  %v3064_v54 = vpop.eup %3063 }
 0x12c   :  { %v600_v46 = vadd.f32 %v599_v44, %v3524_v27  ;;  %v601_v48 = vpop.f32.mrb[27].mxu0  ;;  %v3066_v57 = vpop.eup %3065 }
 0x12d   :  { %v602_v50 = vadd.f32 %v601_v48, %v3526_v29  ;;  %1167 = vmatpush1.bf16.msra.mxu1 %v2973_v42 }
 0x12e   :  { %v786_v52 = vpack.c.bf16 %v600_v46, %v596_v45  ;;  %1168 = vmatprep.subr.bf16.mxu1 %v3163_v47  ;;  %v2980_v45 = vld [vmem:[%s4312_s3 + $0x40] sm:$0xff]  }
 0x12f   :  { %v787_v53 = vpack.c.bf16 %v602_v50, %v598_v49 }
 0x130   :  { %3071 = vtanh.bf16 %v786_v52 }
 0x131   :  { %v605_v55 = vpop.f32.mrb[28].mxu0  ;;  %1169 = vmatpush1.bf16.msra.mxu1 %v2974_v51  ;;  %3073 = vtanh.bf16 %v787_v53 }
 0x132   :  { %v607_v58 = vpop.f32.mrb[29].mxu0  ;;  %1170 = vmatprep.subr.bf16.mxu1 %v3163_v47  ;;  %v606_v1 = vadd.f32 %v605_v55, %v3524_v27 }
 0x133   :  { %v3068_v59 = vpop.eup %3067  ;;  %v609_v61 = vpop.f32.mrb[30].mxu0  ;;  %v608_v7 = vadd.f32 %v607_v58, %v3526_v29 }
 0x134   :  { %v3070_v63 = vpop.eup %3069  ;;  %v610_v3 = vadd.f32 %v609_v61, %v3524_v27  ;;  %v611_v4 = vpop.f32.mrb[31].mxu0  ;;  %v3592_v5 = vadd.bf16 %v3068_v59, %v3064_v54 }
 0x135   :  { %v612_v8 = vadd.f32 %v611_v4, %v3526_v29  ;;  %v3596_v10 = vadd.bf16 %v3070_v63, %v3066_v57  ;;  %1171 = vmatpush1.bf16.msra.mxu1 %v2975_v56 }
 0x136   :  { %v788_v12 = vpack.c.bf16 %v610_v3, %v606_v1  ;;  %1172 = vmatprep.subr.bf16.mxu1 %v3163_v47 }
 0x137   :  { %v789_v13 = vpack.c.bf16 %v612_v8, %v608_v7  ;;  %2569 = vmatprep.mubr.msk.bf16.mxu1 %vm985_vm2, %v3596_v10 }
 0x138   :  { %3075 = vtanh.bf16 %v788_v12  ;;  %1051 = vmatmul.mubr.bf16.gmra.mrb[4].mxu1 %v3592_v5 }
 0x139   :  { %3077 = vtanh.bf16 %v789_v13  ;;  %v615_v14 = vpop.f32.mrb[32].mxu0  ;;  %1173 = vmatpush1.bf16.msra.mxu1 %v2976_v11 }
 0x13a   :  { %v617_v16 = vpop.f32.mrb[33].mxu0  ;;  %1174 = vmatprep.subr.bf16.mxu1 %v3163_v47  ;;  %v616_v18 = vadd.f32 %v615_v14, %v3524_v27 }
 0x13b   :  { %v619_v17 = vpop.f32.mrb[34].mxu0  ;;  %v618_v21 = vadd.f32 %v617_v16, %v3526_v29  ;;  %v3072_v26 = vpop.eup %3071 }
 0x13c   :  { %v620_v19 = vadd.f32 %v619_v17, %v3524_v27  ;;  %v621_v20 = vpop.f32.mrb[35].mxu0  ;;  %v3074_v31 = vpop.eup %3073 }
 0x13d   :  { %v622_v22 = vadd.f32 %v621_v20, %v3526_v29  ;;  %1175 = vmatpush1.bf16.msra.mxu1 %v2977_v15 }
 0x13e   :  { %v790_v24 = vpack.c.bf16 %v620_v19, %v616_v18  ;;  %1176 = vmatprep.subr.bf16.mxu1 %v3163_v47 }
 0x13f   :  { %v791_v25 = vpack.c.bf16 %v622_v22, %v618_v21 }
 0x140   :  { %3079 = vtanh.bf16 %v790_v24 }
 0x141   :  { %v625_v28 = vpop.f32.mrb[36].mxu0  ;;  %1177 = vmatpush1.bf16.msra.mxu1 %v2978_v23  ;;  %3081 = vtanh.bf16 %v791_v25 }
 0x142   :  { %v627_v32 = vpop.f32.mrb[37].mxu0  ;;  %1178 = vmatprep.subr.bf16.mxu1 %v3163_v47  ;;  %v626_v38 = vadd.f32 %v625_v28, %v3524_v27 }
 0x143   :  { %v3076_v33 = vpop.eup %3075  ;;  %v629_v35 = vpop.f32.mrb[38].mxu0  ;;  %v628_v42 = vadd.f32 %v627_v32, %v3526_v29 }
 0x144   :  { %v3078_v36 = vpop.eup %3077  ;;  %v630_v39 = vadd.f32 %v629_v35, %v3524_v27  ;;  %v631_v40 = vpop.f32.mrb[39].mxu0  ;;  %v3623_v41 = vadd.bf16 %v3076_v33, %v3072_v26 }
 0x145   :  { %v632_v43 = vadd.f32 %v631_v40, %v3526_v29  ;;  %v3627_v44 = vadd.bf16 %v3078_v36, %v3074_v31  ;;  %1179 = vmatpush1.bf16.msra.mxu1 %v2979_v30 }
 0x146   :  { %v792_v46 = vpack.c.bf16 %v630_v39, %v626_v38  ;;  %1180 = vmatprep.subr.bf16.mxu1 %v3163_v47 }
 0x147   :  { %v793_v48 = vpack.c.bf16 %v632_v43, %v628_v42  ;;  %2570 = vmatprep.mubr.msk.bf16.mxu1 %vm985_vm2, %v3627_v44  ;;  %2655 = vmatprep.mubr.msk.bf16.mxu0 %vm985_vm2, %v3627_v44 }
 0x148   :  { %3083 = vtanh.bf16 %v792_v46  ;;  %1059 = vmatmul.mubr.bf16.gmra.mrb[8].mxu1 %v3623_v41  ;;  %1559 = vmatmul.mubr.bf16.vlgmr.msra.gmra.mrb[96].mxu0 %v3623_v41 }
 0x149   :  { %3085 = vtanh.bf16 %v793_v48  ;;  %v635_v49 = vpop.f32.mrb[40].mxu0  ;;  %1181 = vmatpush1.bf16.msra.mxu1 %v2980_v45 }
 0x14a   :  { %v637_v50 = vpop.f32.mrb[41].mxu0  ;;  %1337 = vmatprep.subr.bf16.mxu1 %v3163_v47  ;;  %v636_v52 = vadd.f32 %v635_v49, %v3524_v27 }
 0x14b   :  { %v639_v51 = vpop.f32.mrb[42].mxu0  ;;  %v638_v55 = vadd.f32 %v637_v50, %v3526_v29  ;;  %v3080_v59 = vpop.eup %3079 }
 0x14c   :  { %v640_v53 = vadd.f32 %v639_v51, %v3524_v27  ;;  %v641_v54 = vpop.f32.mrb[43].mxu0  ;;  %v3082_v63 = vpop.eup %3081 }
 0x14d   :  { %v642_v56 = vadd.f32 %v641_v54, %v3526_v29 }
 0x14e   :  { %v794_v57 = vpack.c.bf16 %v640_v53, %v636_v52 }
 0x14f   :  { %v795_v58 = vpack.c.bf16 %v642_v56, %v638_v55 }
 0x150   :  { %3087 = vtanh.bf16 %v794_v57 }
 0x151   :  { %v645_v61 = vpop.f32.mrb[44].mxu0  ;;  %3089 = vtanh.bf16 %v795_v58 }
 0x152   :  { %v647_v1 = vpop.f32.mrb[45].mxu0  ;;  %v646_v8 = vadd.f32 %v645_v61, %v3524_v27 }
 0x153   :  { %v3084_v3 = vpop.eup %3083  ;;  %v649_v4 = vpop.f32.mrb[46].mxu0  ;;  %v648_v14 = vadd.f32 %v647_v1, %v3526_v29 }
 0x154   :  { %v3086_v7 = vpop.eup %3085  ;;  %v650_v11 = vadd.f32 %v649_v4, %v3524_v27  ;;  %v651_v12 = vpop.f32.mrb[47].mxu0  ;;  %v3646_v13 = vadd.bf16 %v3084_v3, %v3080_v59 }
 0x155   :  { %v652_v15 = vadd.f32 %v651_v12, %v3526_v29  ;;  %v3650_v16 = vadd.bf16 %v3086_v7, %v3082_v63 }
 0x156   :  { %v796_v17 = vpack.c.bf16 %v650_v11, %v646_v8 }
 0x157   :  { %v797_v18 = vpack.c.bf16 %v652_v15, %v648_v14  ;;  %2571 = vmatprep.mubr.msk.bf16.mxu1 %vm985_vm2, %v3650_v16  ;;  %2656 = vmatprep.mubr.msk.bf16.mxu0 %vm985_vm2, %v3650_v16 }
 0x158   :  { %3091 = vtanh.bf16 %v796_v17  ;;  %1067 = vmatmul.mubr.bf16.gmra.mrb[12].mxu1 %v3646_v13  ;;  %1567 = vmatmul.mubr.bf16.gmra.mrb[100].mxu0 %v3646_v13 }
 0x159   :  { %3093 = vtanh.bf16 %v797_v18  ;;  %v655_v19 = vpop.f32.mrb[48].mxu0 }
 0x15a   :  { %v657_v20 = vpop.f32.mrb[49].mxu0  ;;  %v656_v22 = vadd.f32 %v655_v19, %v3524_v27 }
 0x15b   :  { %v659_v21 = vpop.f32.mrb[50].mxu0  ;;  %v658_v25 = vadd.f32 %v657_v20, %v3526_v29  ;;  %v3088_v31 = vpop.eup %3087 }
 0x15c   :  { %v660_v23 = vadd.f32 %v659_v21, %v3524_v27  ;;  %v661_v24 = vpop.f32.mrb[51].mxu0  ;;  %v3090_v33 = vpop.eup %3089 }
 0x15d   :  { %v662_v26 = vadd.f32 %v661_v24, %v3526_v29 }
 0x15e   :  { %v798_v28 = vpack.c.bf16 %v660_v23, %v656_v22 }
 0x15f   :  { %v799_v30 = vpack.c.bf16 %v662_v26, %v658_v25 }
 0x160   :  { %3095 = vtanh.bf16 %v798_v28 }
 0x161   :  { %v665_v32 = vpop.f32.mrb[52].mxu0  ;;  %3097 = vtanh.bf16 %v799_v30 }
 0x162   :  { %v667_v35 = vpop.f32.mrb[53].mxu0  ;;  %v666_v40 = vadd.f32 %v665_v32, %v3524_v27 }
 0x163   :  { %v3092_v36 = vpop.eup %3091  ;;  %v669_v38 = vpop.f32.mrb[54].mxu0  ;;  %v668_v46 = vadd.f32 %v667_v35, %v3526_v29 }
 0x164   :  { %v3094_v39 = vpop.eup %3093  ;;  %v670_v42 = vadd.f32 %v669_v38, %v3524_v27  ;;  %v671_v43 = vpop.f32.mrb[55].mxu0  ;;  %v3664_v45 = vadd.bf16 %v3092_v36, %v3088_v31 }
 0x165   :  { %v672_v48 = vadd.f32 %v671_v43, %v3526_v29  ;;  %v3668_v49 = vadd.bf16 %v3094_v39, %v3090_v33 }
 0x166   :  { %v800_v50 = vpack.c.bf16 %v670_v42, %v666_v40 }
 0x167   :  { %v801_v51 = vpack.c.bf16 %v672_v48, %v668_v46  ;;  %2572 = vmatprep.mubr.msk.bf16.mxu1 %vm985_vm2, %v3668_v49  ;;  %2657 = vmatprep.mubr.msk.bf16.mxu0 %vm985_vm2, %v3668_v49 }
 0x168   :  { %3099 = vtanh.bf16 %v800_v50  ;;  %1075 = vmatmul.mubr.bf16.gmra.mrb[16].mxu1 %v3664_v45  ;;  %1575 = vmatmul.mubr.bf16.gmra.mrb[104].mxu0 %v3664_v45 }
 0x169   :  { %3101 = vtanh.bf16 %v801_v51  ;;  %v675_v52 = vpop.f32.mrb[56].mxu0 }
 0x16a   :  { %v677_v53 = vpop.f32.mrb[57].mxu0  ;;  %v676_v55 = vadd.f32 %v675_v52, %v3524_v27 }
 0x16b   :  { %v679_v54 = vpop.f32.mrb[58].mxu0  ;;  %v678_v58 = vadd.f32 %v677_v53, %v3526_v29  ;;  %v3096_v1 = vpop.eup %3095 }
 0x16c   :  { %v680_v56 = vadd.f32 %v679_v54, %v3524_v27  ;;  %v681_v57 = vpop.f32.mrb[59].mxu0  ;;  %v3098_v4 = vpop.eup %3097 }
 0x16d   :  { %v682_v59 = vadd.f32 %v681_v57, %v3526_v29 }
 0x16e   :  { %v802_v61 = vpack.c.bf16 %v680_v56, %v676_v55 }
 0x16f   :  { %v803_v63 = vpack.c.bf16 %v682_v59, %v678_v58 }
 0x170   :  { %3103 = vtanh.bf16 %v802_v61 }
 0x171   :  { %v685_v3 = vpop.f32.mrb[60].mxu0  ;;  %3105 = vtanh.bf16 %v803_v63 }
 0x172   :  { %v687_v7 = vpop.f32.mrb[61].mxu0  ;;  %v686_v14 = vadd.f32 %v685_v3, %v3524_v27 }
 0x173   :  { %v3100_v8 = vpop.eup %3099  ;;  %v689_v11 = vpop.f32.mrb[62].mxu0  ;;  %v688_v19 = vadd.f32 %v687_v7, %v3526_v29 }
 0x174   :  { %v3102_v12 = vpop.eup %3101  ;;  %v690_v15 = vadd.f32 %v689_v11, %v3524_v27  ;;  %v691_v17 = vpop.f32.mrb[63].mxu0  ;;  %v3682_v18 = vadd.bf16 %v3100_v8, %v3096_v1 }
 0x175   :  { %v692_v20 = vadd.f32 %v691_v17, %v3526_v29  ;;  %v3686_v21 = vadd.bf16 %v3102_v12, %v3098_v4 }
 0x176   :  { %v804_v22 = vpack.c.bf16 %v690_v15, %v686_v14 }
 0x177   :  { %v805_v23 = vpack.c.bf16 %v692_v20, %v688_v19  ;;  %2573 = vmatprep.mubr.msk.bf16.mxu1 %vm985_vm2, %v3686_v21  ;;  %2658 = vmatprep.mubr.msk.bf16.mxu0 %vm985_vm2, %v3686_v21 }
 0x178   :  { %3107 = vtanh.bf16 %v804_v22  ;;  %1083 = vmatmul.mubr.bf16.gmra.mrb[20].mxu1 %v3682_v18  ;;  %1583 = vmatmul.mubr.bf16.gmra.mrb[108].mxu0 %v3682_v18 }
 0x179   :  { %3109 = vtanh.bf16 %v805_v23  ;;  %v695_v24 = vpop.f32.mrb[64].mxu0 }
 0x17a   :  { %v697_v25 = vpop.f32.mrb[65].mxu0  ;;  %v696_v28 = vadd.f32 %v695_v24, %v3524_v27 }
 0x17b   :  { %v699_v26 = vpop.f32.mrb[66].mxu0  ;;  %v698_v32 = vadd.f32 %v697_v25, %v3526_v29  ;;  %v3104_v38 = vpop.eup %3103 }
 0x17c   :  { %v700_v30 = vadd.f32 %v699_v26, %v3524_v27  ;;  %v701_v31 = vpop.f32.mrb[67].mxu0  ;;  %v3106_v40 = vpop.eup %3105 }
 0x17d   :  { %v702_v33 = vadd.f32 %v701_v31, %v3526_v29 }
 0x17e   :  { %v806_v35 = vpack.c.bf16 %v700_v30, %v696_v28 }
 0x17f   :  { %v807_v36 = vpack.c.bf16 %v702_v33, %v698_v32 }
 0x180   :  { %3111 = vtanh.bf16 %v806_v35 }
 0x181   :  { %v705_v39 = vpop.f32.mrb[68].mxu0  ;;  %3113 = vtanh.bf16 %v807_v36 }
 0x182   :  { %v707_v42 = vpop.f32.mrb[69].mxu0  ;;  %v706_v50 = vadd.f32 %v705_v39, %v3524_v27 }
 0x183   :  { %v3108_v43 = vpop.eup %3107  ;;  %v709_v46 = vpop.f32.mrb[70].mxu0  ;;  %v708_v54 = vadd.f32 %v707_v42, %v3526_v29 }
 0x184   :  { %v3110_v48 = vpop.eup %3109  ;;  %v710_v51 = vadd.f32 %v709_v46, %v3524_v27  ;;  %v711_v52 = vpop.f32.mrb[71].mxu0  ;;  %v3700_v53 = vadd.bf16 %v3108_v43, %v3104_v38 }
 0x185   :  { %v712_v55 = vadd.f32 %v711_v52, %v3526_v29  ;;  %v3704_v56 = vadd.bf16 %v3110_v48, %v3106_v40  ;;  %v2981_v48 = vld [vmem:[%s4312_s3 + $0x90] sm:$0xff]  }
 0x186   :  { %v808_v57 = vpack.c.bf16 %v710_v51, %v706_v50  ;;  %v2982_v51 = vld [vmem:[%s4312_s3 + $0x98] sm:$0xff]  }
 0x187   :  { %v809_v58 = vpack.c.bf16 %v712_v55, %v708_v54  ;;  %2574 = vmatprep.mubr.msk.bf16.mxu1 %vm985_vm2, %v3704_v56  ;;  %2659 = vmatprep.mubr.msk.bf16.mxu0 %vm985_vm2, %v3704_v56 }
 0x188   :  { %3115 = vtanh.bf16 %v808_v57  ;;  %1091 = vmatmul.mubr.bf16.gmra.mrb[24].mxu1 %v3700_v53  ;;  %1591 = vmatmul.mubr.bf16.gmra.mrb[112].mxu0 %v3700_v53 }
 0x189   :  { %3117 = vtanh.bf16 %v809_v58  ;;  %v715_v59 = vpop.f32.mrb[72].mxu0 }
 0x18a   :  { %v716_v61 = vadd.f32 %v715_v59, %v3524_v27  ;;  %v717_v63 = vpop.f32.mrb[73].mxu0 }
 0x18b   :  { %v718_v1 = vadd.f32 %v717_v63, %v3526_v29  ;;  %v719_v3 = vpop.f32.mrb[74].mxu0  ;;  %v3112_v14 = vpop.eup %3111  ;;  %v2983_v63 = vld [vmem:[%s4312_s3 + $0xa0] sm:$0xff]  }
 0x18c   :  { %v720_v4 = vadd.f32 %v719_v3, %v3524_v27  ;;  %v721_v7 = vpop.f32.mrb[75].mxu0  ;;  %v3114_v17 = vpop.eup %3113 }
 0x18d   :  { %v722_v8 = vadd.f32 %v721_v7, %v3526_v29 }
 0x18e   :  { %v810_v11 = vpack.c.bf16 %v720_v4, %v716_v61 }
 0x18f   :  { %v811_v12 = vpack.c.bf16 %v722_v8, %v718_v1  ;;  %v2984_v8 = vld [vmem:[%s4312_s3 + $0xa8] sm:$0xff]  }
 0x190   :  { %3119 = vtanh.bf16 %v810_v11 }
 0x191   :  { %v725_v15 = vpop.f32.mrb[76].mxu0  ;;  %3121 = vtanh.bf16 %v811_v12 }
 0x192   :  { %v726_v19 = vadd.f32 %v725_v15, %v3524_v27  ;;  %v727_v20 = vpop.f32.mrb[77].mxu0 }
 0x193   :  { %v3116_v22 = vpop.eup %3115  ;;  %v728_v23 = vadd.f32 %v727_v20, %v3526_v29  ;;  %v729_v24 = vpop.f32.mrb[78].mxu0  ;;  %v2985_v20 = vld [vmem:[%s4312_s3 + $0xb0] sm:$0xff]  }
 0x194   :  { %v3118_v25 = vpop.eup %3117  ;;  %v3718_v26 = vadd.bf16 %v3116_v22, %v3112_v14  ;;  %v730_v28 = vadd.f32 %v729_v24, %v3524_v27  ;;  %v731_v30 = vpop.f32.mrb[79].mxu0 }
 0x195   :  { %v3721_v31 = vadd.bf16 %v3118_v25, %v3114_v17  ;;  %v732_v32 = vadd.f32 %v731_v30, %v3526_v29 }
 0x196   :  { %v812_v33 = vpack.c.bf16 %v730_v28, %v726_v19  ;;  %v2986_v28 = vld [vmem:[%s4312_s3 + $0xb8] sm:$0xff]  }
 0x197   :  { %2575 = vmatprep.mubr.msk.bf16.mxu1 %vm985_vm2, %v3721_v31  ;;  %2660 = vmatprep.mubr.msk.bf16.mxu0 %vm985_vm2, %v3721_v31  ;;  %v813_v35 = vpack.c.bf16 %v732_v32, %v728_v23 }
 0x198   :  { %1099 = vmatmul.mubr.bf16.gmra.mrb[28].mxu1 %v3718_v26  ;;  %1599 = vmatmul.mubr.bf16.gmra.mrb[116].mxu0 %v3718_v26  ;;  %3123 = vtanh.bf16 %v812_v33 }
 0x199   :  { %2585 = vmatprep.mubr.msk.bf16.mxu1 %vm985_vm2, %v871_v9  ;;  %3125 = vtanh.bf16 %v813_v35  ;;  %v735_v36 = vpop.f32.mrb[80].mxu0 }
 0x19a   :  { %v736_v38 = vadd.f32 %v735_v36, %v3524_v27  ;;  %v737_v39 = vpop.f32.mrb[81].mxu0 }
 0x19b   :  { %v738_v40 = vadd.f32 %v737_v39, %v3526_v29  ;;  %v739_v42 = vpop.f32.mrb[82].mxu0  ;;  %v3120_v9 = vpop.eup %3119 }
 0x19c   :  { %v740_v43 = vadd.f32 %v739_v42, %v3524_v27  ;;  %v741_v46 = vpop.f32.mrb[83].mxu0  ;;  %v3122_v54 = vpop.eup %3121 }
 0x19d   :  { %v742_v50 = vadd.f32 %v741_v46, %v3526_v29 }
 0x19e   :  { %v814_v62 = vpack.c.bf16 %v740_v43, %v736_v38 }
 0x19f   :  { %v815_v2 = vpack.c.bf16 %v742_v50, %v738_v40 }
 0x1a0   :  { %1197 = vmatmul.mubr.bf16.vlgmr.msra.gmra.mrb[32].mxu1 %v870_v6  ;;  %3127 = vtanh.bf16 %v814_v62 }
 0x1a1   :  { %1338 = vmatpush1.bf16.msra.mxu1 %v2981_v48  ;;  %2586 = vmatprep.mubr.msk.bf16.mxu1 %vm985_vm2, %v3566_v37  ;;  %v745_v52 = vpop.f32.mrb[84].mxu0  ;;  %3129 = vtanh.bf16 %v815_v2  ;;  %v2987_v48 = vld [vmem:[%s4312_s3 + $0xc0] sm:$0xff]  }
 0x1a2   :  { %1339 = vmatprep.subr.bf16.mxu1 %v3163_v47  ;;  %v746_v55 = vadd.f32 %v745_v52, %v3524_v27  ;;  %v747_v57 = vpop.f32.mrb[85].mxu0 }
 0x1a3   :  { %v3124_v58 = vpop.eup %3123  ;;  %v748_v60 = vadd.f32 %v747_v57, %v3526_v29  ;;  %v749_v0 = vpop.f32.mrb[86].mxu0 }
 0x1a4   :  { %v3126_v6 = vpop.eup %3125  ;;  %v750_v59 = vadd.f32 %v749_v0, %v3524_v27  ;;  %v751_v61 = vpop.f32.mrb[87].mxu0  ;;  %v3753_v37 = vadd.bf16 %v3124_v58, %v3120_v9  ;;  %v2991_v0 = vld [vmem:[%s4312_s3 + $0x128] sm:$0xff]  }
 0x1a5   :  { %1340 = vmatpush1.bf16.msra.mxu1 %v2982_v51  ;;  %v752_v1 = vadd.f32 %v751_v61, %v3526_v29  ;;  %v3759_v3 = vadd.bf16 %v3126_v6, %v3122_v54  ;;  %v2996_v6 = vld [vmem:[%s4312_s3 + $0x150] sm:$0xff]  }
 0x1a6   :  { %1341 = vmatprep.subr.bf16.mxu1 %v3163_v47  ;;  %v816_v4 = vpack.c.bf16 %v750_v59, %v746_v55  ;;  %v2997_v59 = vld [vmem:[%s4312_s3 + $0x158] sm:$0xff]  }
 0x1a7   :  { %v817_v7 = vpack.c.bf16 %v752_v1, %v748_v60  ;;  %2661 = vmatprep.mubr.msk.bf16.mxu0 %vm985_vm2, %v3759_v3  ;;  %v2990_v60 = vld [vmem:[%s4312_s3 + $0x120] sm:$0xff]  }
 0x1a8   :  { %1205 = vmatmul.mubr.bf16.gmra.mrb[36].mxu1 %v3562_v34  ;;  %3131 = vtanh.bf16 %v816_v4  ;;  %1607 = vmatmul.mubr.bf16.gmra.mrb[120].mxu0 %v3753_v37  ;;  %v2998_v4 = vld [vmem:[%s4312_s3 + $0x160] sm:$0xff]  }
 0x1a9   :  { %2587 = vmatprep.mubr.msk.bf16.mxu1 %vm985_vm2, %v3596_v10  ;;  %1342 = vmatpush1.bf16.msra.mxu1 %v2983_v63  ;;  %3133 = vtanh.bf16 %v817_v7  ;;  %v755_v11 = vpop.f32.mrb[88].mxu0 }
 0x1aa   :  { %1343 = vmatprep.subr.bf16.mxu1 %v3163_v47  ;;  %v756_v12 = vadd.f32 %v755_v11, %v3524_v27  ;;  %v757_v14 = vpop.f32.mrb[89].mxu0 }
 0x1ab   :  { %v758_v34 = vadd.f32 %v757_v14, %v3526_v29  ;;  %v759_v15 = vpop.f32.mrb[90].mxu0  ;;  %v3128_v25 = vpop.eup %3127 }
 0x1ac   :  { %v760_v17 = vadd.f32 %v759_v15, %v3524_v27  ;;  %v761_v19 = vpop.f32.mrb[91].mxu0  ;;  %v3130_v32 = vpop.eup %3129 }
 0x1ad   :  { %1344 = vmatpush1.bf16.msra.mxu1 %v2984_v8  ;;  %v762_v22 = vadd.f32 %v761_v19, %v3526_v29 }
 0x1ae   :  { %1345 = vmatprep.subr.bf16.mxu1 %v3163_v47  ;;  %v818_v23 = vpack.c.bf16 %v760_v17, %v756_v12 }
 0x1af   :  { %v819_v24 = vpack.c.bf16 %v762_v22, %v758_v34 }
 0x1b0   :  { %1213 = vmatmul.mubr.bf16.gmra.mrb[40].mxu1 %v3592_v5  ;;  %3135 = vtanh.bf16 %v818_v23 }
 0x1b1   :  { %2588 = vmatprep.mubr.msk.bf16.mxu1 %vm985_vm2, %v3627_v44  ;;  %1346 = vmatpush1.bf16.msra.mxu1 %v2985_v20  ;;  %v765_v30 = vpop.f32.mrb[92].mxu0  ;;  %3137 = vtanh.bf16 %v819_v24 }
 0x1b2   :  { %1347 = vmatprep.subr.bf16.mxu1 %v3163_v47  ;;  %v766_v33 = vadd.f32 %v765_v30, %v3524_v27  ;;  %v767_v35 = vpop.f32.mrb[93].mxu0 }
 0x1b3   :  { %v3132_v36 = vpop.eup %3131  ;;  %v768_v38 = vadd.f32 %v767_v35, %v3526_v29  ;;  %v769_v39 = vpop.f32.mrb[94].mxu0 }
 0x1b4   :  { %v3134_v40 = vpop.eup %3133  ;;  %v770_v42 = vadd.f32 %v769_v39, %v3524_v27  ;;  %v771_v43 = vpop.f32.mrb[95].mxu0  ;;  %v3790_v46 = vadd.bf16 %v3132_v36, %v3128_v25  ;;  %v2988_v27 = vld [vmem:[%s4312_s3 + $0xc8] sm:$0xff]  }
 0x1b5   :  { %1348 = vmatpush1.bf16.msra.mxu1 %v2986_v28  ;;  %v3795_v50 = vadd.bf16 %v3134_v40, %v3130_v32  ;;  %v772_v62 = vadd.f32 %v771_v43, %v3526_v29  ;;  %v2989_v29 = vld [vmem:[%s4312_s3 + $0xd0] sm:$0xff]  }
 0x1b6   :  { %1349 = vmatprep.subr.bf16.mxu1 %v3163_v47  ;;  %v820_v2 = vpack.c.bf16 %v770_v42, %v766_v33 }
 0x1b7   :  { %2662 = vmatprep.mubr.msk.bf16.mxu0 %vm985_vm2, %v3795_v50  ;;  %v821_v9 = vpack.c.bf16 %v772_v62, %v768_v38 }
 0x1b8   :  { %1221 = vmatmul.mubr.bf16.gmra.mrb[44].mxu1 %v3623_v41  ;;  %1615 = vmatmul.mubr.bf16.gmra.mrb[124].mxu0 %v3790_v46  ;;  %3139 = vtanh.bf16 %v820_v2 }
 0x1b9   :  { %2589 = vmatprep.mubr.msk.bf16.mxu1 %vm985_vm2, %v3650_v16  ;;  %1350 = vmatpush1.bf16.msra.mxu1 %v2987_v48  ;;  %3141 = vtanh.bf16 %v821_v9 }
 0x1ba   :  { %1351 = vmatprep.subr.bf16.mxu1 %v3163_v47 }
 0x1bb   :  { %v3817_v51 = vpop.eup %3135 }
 0x1bc   :  { %v3819_v52 = vpop.eup %3137 }
 0x1bd   :  { %1352 = vmatpush1.bf16.msra.mxu1 %v2988_v27 }
 0x1be   :  { %1353 = vmatprep.subr.bf16.mxu1 %v3163_v47 }
 0x1c0   :  { %1229 = vmatmul.mubr.bf16.gmra.mrb[48].mxu1 %v3646_v13 }
 0x1c1   :  { %2590 = vmatprep.mubr.msk.bf16.mxu1 %vm985_vm2, %v3668_v49  ;;  %1354 = vmatpush1.bf16.msra.mxu1 %v2989_v29 }
 0x1c2   :  { %1715 = vmatprep.subr.bf16.mxu1 %v3163_v47 }
 0x1c3   :  { %v3821_v54 = vpop.eup %3139 }
 0x1c4   :  { %v3823_v55 = vpop.eup %3141  ;;  %v892_v58 = vadd.bf16 %v3821_v54, %v3817_v51 }
 0x1c5   :  { %v893_v57 = vadd.bf16 %v3823_v55, %v3819_v52 }
 0x1c8   :  { %1237 = vmatmul.mubr.bf16.gmra.mrb[52].mxu1 %v3664_v45 }
 0x1c9   :  { %2591 = vmatprep.mubr.msk.bf16.mxu1 %vm985_vm2, %v3686_v21 }
 0x1d0   :  { %1245 = vmatmul.mubr.bf16.gmra.mrb[56].mxu1 %v3682_v18 }
 0x1d1   :  { %2592 = vmatprep.mubr.msk.bf16.mxu1 %vm985_vm2, %v3704_v56 }
 0x1d8   :  { %1253 = vmatmul.mubr.bf16.gmra.mrb[60].mxu1 %v3700_v53 }
 0x1d9   :  { %2620 = vmatprep.mubr.msk.bf16.mxu1 %vm985_vm2, %v3596_v10  ;;  %v2992_v10 = vld [vmem:[%s4312_s3 + $0x130] sm:$0xff]  }
 0x1e0   :  { %1370 = vmatmul.mubr.bf16.vlgmr.msra.gmra.mrb[64].mxu1 %v3592_v5  ;;  %v2993_v5 = vld [vmem:[%s4312_s3 + $0x138] sm:$0xff]  }
 0x1e1   :  { %1716 = vmatpush1.bf16.msra.mxu1 %v2990_v60  ;;  %2621 = vmatprep.mubr.msk.bf16.mxu1 %vm985_vm2, %v3627_v44  ;;  %v2994_v44 = vld [vmem:[%s4312_s3 + $0x140] sm:$0xff]  }
 0x1e2   :  { %1717 = vmatprep.subr.bf16.mxu1 %v3163_v47 }
 0x1e5   :  { %1718 = vmatpush1.bf16.msra.mxu1 %v2991_v0 }
 0x1e6   :  { %1719 = vmatprep.subr.bf16.mxu1 %v3163_v47 }
 0x1e8   :  { %1378 = vmatmul.mubr.bf16.gmra.mrb[68].mxu1 %v3623_v41  ;;  %v2995_v41 = vld [vmem:[%s4312_s3 + $0x148] sm:$0xff]  }
 0x1e9   :  { %2622 = vmatprep.mubr.msk.bf16.mxu1 %vm985_vm2, %v3650_v16  ;;  %1720 = vmatpush1.bf16.msra.mxu1 %v2992_v10 }
 0x1ea   :  { %1721 = vmatprep.subr.bf16.mxu1 %v3163_v47 }
 0x1ed   :  { %1722 = vmatpush1.bf16.msra.mxu1 %v2993_v5 }
 0x1ee   :  { %1723 = vmatprep.subr.bf16.mxu1 %v3163_v47 }
 0x1f0   :  { %1386 = vmatmul.mubr.bf16.gmra.mrb[72].mxu1 %v3646_v13 }
 0x1f1   :  { %2623 = vmatprep.mubr.msk.bf16.mxu1 %vm985_vm2, %v3668_v49  ;;  %1724 = vmatpush1.bf16.msra.mxu1 %v2994_v44 }
 0x1f2   :  { %1725 = vmatprep.subr.bf16.mxu1 %v3163_v47 }
 0x1f5   :  { %1726 = vmatpush1.bf16.msra.mxu1 %v2995_v41 }
 0x1f6   :  { %1727 = vmatprep.subr.bf16.mxu1 %v3163_v47 }
 0x1f8   :  { %1394 = vmatmul.mubr.bf16.gmra.mrb[76].mxu1 %v3664_v45 }
 0x1f9   :  { %2624 = vmatprep.mubr.msk.bf16.mxu1 %vm985_vm2, %v3686_v21  ;;  %1728 = vmatpush1.bf16.msra.mxu1 %v2996_v6 }
 0x1fa   :  { %1729 = vmatprep.subr.bf16.mxu1 %v3163_v47 }
 0x1fb   :  { %v3881_v61 = vpop.f32.mrb[0].mxu1 }
 0x1fc   :  { %v1046_v63 = vpop.f32.mrb[1].mxu1 }
 0x1fd   :  { %v3883_v1 = vpop.f32.mrb[2].mxu1  ;;  %1730 = vmatpush1.bf16.msra.mxu1 %v2997_v59 }
 0x1fe   :  { %v1049_v7 = vpop.f32.mrb[3].mxu1  ;;  %1731 = vmatprep.subr.bf16.mxu1 %v3163_v47 }
 0x200   :  { %1402 = vmatmul.mubr.bf16.gmra.mrb[80].mxu1 %v3682_v18 }
 0x201   :  { %2625 = vmatprep.mubr.msk.bf16.mxu1 %vm985_vm2, %v3704_v56  ;;  %1732 = vmatpush1.bf16.msra.mxu1 %v2998_v4 }
 0x208   :  { %1410 = vmatmul.mubr.bf16.gmra.mrb[84].mxu1 %v3700_v53 }
 0x209   :  { %2626 = vmatprep.mubr.msk.bf16.mxu1 %vm985_vm2, %v3721_v31 }
 0x20b   :  { %v3895_v8 = vpop.f32.mrb[4].mxu1 }
 0x20c   :  { %v1054_v11 = vpop.f32.mrb[5].mxu1 }
 0x20d   :  { %v3897_v12 = vpop.f32.mrb[6].mxu1 }
 0x20e   :  { %v1057_v14 = vpop.f32.mrb[7].mxu1 }
 0x210   :  { %1418 = vmatmul.mubr.bf16.gmra.mrb[88].mxu1 %v3718_v26 }
 0x211   :  { %2627 = vmatprep.mubr.msk.bf16.mxu1 %vm985_vm2, %v3759_v3 }
 0x218   :  { %1426 = vmatmul.mubr.bf16.gmra.mrb[92].mxu1 %v3753_v37 }
 0x219   :  { %2690 = vmatprep.mubr.msk.bf16.mxu1 %vm985_vm2, %v3650_v16 }
 0x21b   :  { %v3905_v47 = vpop.f32.mrb[8].mxu1  ;;  %v3907_v34 = vpop.f32.mrb[96].mxu0 }
 0x21c   :  { %v1062_v15 = vpop.f32.mrb[9].mxu1  ;;  %v1562_v17 = vpop.f32.mrb[97].mxu0 }
 0x21d   :  { %v3909_v19 = vpop.f32.mrb[10].mxu1  ;;  %v3911_v20 = vpop.f32.mrb[98].mxu0 }
 0x21e   :  { %v1065_v22 = vpop.f32.mrb[11].mxu1  ;;  %v1565_v23 = vpop.f32.mrb[99].mxu0 }
 0x21f   :  { %v3000_v23 = vld [vmem:[%s4314_s5] sm:$0xff]  }
 0x220   :  { %1748 = vmatmul.mubr.bf16.vlgmr.msra.gmra.mrb[96].mxu1 %v3646_v13 }
 0x221   :  { %2691 = vmatprep.mubr.msk.bf16.mxu1 %vm985_vm2, %v3668_v49 }
 0x228   :  { %1756 = vmatmul.mubr.bf16.gmra.mrb[100].mxu1 %v3664_v45 }
 0x229   :  { %2692 = vmatprep.mubr.msk.bf16.mxu1 %vm985_vm2, %v3686_v21 }
 0x22b   :  { %v3919_v16 = vpop.f32.mrb[12].mxu1  ;;  %v3921_v24 = vpop.f32.mrb[100].mxu0 }
 0x22c   :  { %v1070_v25 = vpop.f32.mrb[13].mxu1  ;;  %v1570_v28 = vpop.f32.mrb[101].mxu0 }
 0x22d   :  { %v3923_v30 = vpop.f32.mrb[14].mxu1  ;;  %v3925_v32 = vpop.f32.mrb[102].mxu0 }
 0x22e   :  { %v1073_v33 = vpop.f32.mrb[15].mxu1  ;;  %v1573_v13 = vpop.f32.mrb[103].mxu0 }
 0x22f   :  { %v3003_v13 = vld [vmem:[%s4314_s5 + $0x48] sm:$0xff]  }
 0x230   :  { %1764 = vmatmul.mubr.bf16.gmra.mrb[104].mxu1 %v3682_v18 }
 0x231   :  { %2693 = vmatprep.mubr.msk.bf16.mxu1 %vm985_vm2, %v3704_v56 }
 0x238   :  { %1772 = vmatmul.mubr.bf16.gmra.mrb[108].mxu1 %v3700_v53 }
 0x239   :  { %2694 = vmatprep.mubr.msk.bf16.mxu1 %vm985_vm2, %v3721_v31 }
 0x23b   :  { %v3933_v45 = vpop.f32.mrb[16].mxu1  ;;  %v3935_v49 = vpop.f32.mrb[104].mxu0 }
 0x23c   :  { %v1078_v21 = vpop.f32.mrb[17].mxu1  ;;  %v1578_v35 = vpop.f32.mrb[105].mxu0 }
 0x23d   :  { %v3937_v36 = vpop.f32.mrb[18].mxu1  ;;  %v3939_v38 = vpop.f32.mrb[106].mxu0 }
 0x23e   :  { %v1081_v39 = vpop.f32.mrb[19].mxu1  ;;  %v1581_v18 = vpop.f32.mrb[107].mxu0 }
 0x23f   :  { %v3004_v39 = vld [vmem:[%s4314_s5 + $0x8] sm:$0xff]   ;;  %v3006_v18 = vld [vmem:[%s4314_s5 + $0x50] sm:$0xff]  }
 0x240   :  { %1780 = vmatmul.mubr.bf16.gmra.mrb[112].mxu1 %v3718_v26 }
 0x241   :  { %2695 = vmatprep.mubr.msk.bf16.mxu1 %vm985_vm2, %v3759_v3 }
 0x248   :  { %1788 = vmatmul.mubr.bf16.gmra.mrb[116].mxu1 %v3753_v37 }
 0x249   :  { %2696 = vmatprep.mubr.msk.bf16.mxu1 %vm985_vm2, %v3795_v50 }
 0x24b   :  { %v3947_v53 = vpop.f32.mrb[20].mxu1  ;;  %v3949_v56 = vpop.f32.mrb[108].mxu0 }
 0x24c   :  { %v1086_v31 = vpop.f32.mrb[21].mxu1  ;;  %v1586_v40 = vpop.f32.mrb[109].mxu0 }
 0x24d   :  { %v3951_v42 = vpop.f32.mrb[22].mxu1  ;;  %v3953_v43 = vpop.f32.mrb[110].mxu0 }
 0x24e   :  { %v1089_v48 = vpop.f32.mrb[23].mxu1  ;;  %v1589_v26 = vpop.f32.mrb[111].mxu0 }
 0x250   :  { %1796 = vmatmul.mubr.bf16.gmra.mrb[120].mxu1 %v3790_v46 }
 0x251   :  { %2697 = vmatprep.mubr.msk.bf16.mxu1 %vm985_vm2, %v893_v57 }
 0x258   :  { %1804 = vmatmul.mubr.bf16.gmra.mrb[124].mxu1 %v892_v58 }
 0x25b   :  { %v3963_v37 = vpop.f32.mrb[24].mxu1  ;;  %v3965_v3 = vpop.f32.mrb[112].mxu0 }
 0x25c   :  { %v1094_v50 = vpop.f32.mrb[25].mxu1  ;;  %v1594_v62 = vpop.f32.mrb[113].mxu0 }
 0x25d   :  { %v3967_v2 = vpop.f32.mrb[26].mxu1  ;;  %v3969_v9 = vpop.f32.mrb[114].mxu0  ;;  %v3005_v62 = vld [vmem:[%s4314_s5 + $0xc8] sm:$0xff]  }
 0x25e   :  { %v1097_v46 = vpop.f32.mrb[27].mxu1  ;;  %v1597_v27 = vpop.f32.mrb[115].mxu0 }
 0x26b   :  { %v3971_v29 = vpop.f32.mrb[28].mxu1  ;;  %v3973_v52 = vpop.f32.mrb[116].mxu0 }
 0x26c   :  { %v1102_v55 = vpop.f32.mrb[29].mxu1  ;;  %v1602_v57 = vpop.f32.mrb[117].mxu0 }
 0x26d   :  { %v3975_v51 = vpop.f32.mrb[30].mxu1  ;;  %v3977_v54 = vpop.f32.mrb[118].mxu0  ;;  %v3009_v55 = vld [vmem:[%s4314_s5 + $0x58] sm:$0xff]  }
 0x26e   :  { %v1105_v58 = vpop.f32.mrb[31].mxu1  ;;  %v1605_v60 = vpop.f32.mrb[119].mxu0 }
 0x273   :  { %v1198_v0 = vpop.f32.mrb[32].mxu1 }
 0x274   :  { %v3980_v10 = vadd.f32 %v1198_v0, %v3881_v61  ;;  %v1200_v5 = vpop.f32.mrb[33].mxu1  ;;  %v3010_v0 = vld [vmem:[%s4314_s5 + $0x18] sm:$0xff]  }
 0x275   :  { %v1201_v44 = vpop.f32.mrb[34].mxu1  ;;  %v3012_v5 = vld [vmem:[%s4314_s5 + $0x60] sm:$0xff]  }
 0x276   :  { %v3983_v41 = vadd.f32 %v1201_v44, %v3883_v1  ;;  %v1203_v6 = vpop.f32.mrb[35].mxu1  ;;  %v2999_v1 = vld [vmem:[%s4314_s5 + $0x40] sm:$0xff]  }
 0x277   :  { %2750 = vmatprep.subr.bf16.mxu0 %v2999_v1  ;;  %v3016_v1 = vld [vmem:[%s4314_s5 + $0x28] sm:$0xff]  }
 0x278   :  { %2751 = vmatpush3.bf16.msra.mxu0 %v3000_v23  ;;  %v3018_v23 = vld [vmem:[%s4314_s5 + $0x70] sm:$0xff]  }
 0x279   :  { %2752 = vmatprep.subr.bf16.mxu0 %v3003_v13 }
 0x27b   :  { %v1206_v59 = vpop.f32.mrb[36].mxu1  ;;  %v3985_v63 = vpop.f32.mrb[120].mxu0 }
 0x27c   :  { %v3988_v4 = vadd.f32 %v1206_v59, %v3895_v8  ;;  %v1208_v7 = vpop.f32.mrb[37].mxu1  ;;  %v1610_v11 = vpop.f32.mrb[121].mxu0  ;;  %2753 = vmatpush3.bf16.msra.mxu0 %v3004_v39 }
 0x27d   :  { %v1209_v14 = vpop.f32.mrb[38].mxu1  ;;  %v3990_v15 = vpop.f32.mrb[122].mxu0  ;;  %2754 = vmatprep.subr.bf16.mxu0 %v3006_v18  ;;  %v3011_v7 = vld [vmem:[%s4314_s5 + $0xd0] sm:$0xff]   ;;  %v3022_v18 = vld [vmem:[%s4314_s5 + $0x38] sm:$0xff]  }
 0x27e   :  { %v3993_v61 = vadd.f32 %v1209_v14, %v3897_v12  ;;  %v1211_v17 = vpop.f32.mrb[39].mxu1  ;;  %v1613_v22 = vpop.f32.mrb[123].mxu0  ;;  %v3001_v12 = vld [vmem:[%s4314_s5 + $0xc0] sm:$0xff]   ;;  %v3015_v14 = vld [vmem:[%s4314_s5 + $0x68] sm:$0xff]  }
 0x27f   :  { %2772 = vmatprep.subr.bf16.mxu1 %v3001_v12 }
 0x283   :  { %v1214_v8 = vpop.f32.mrb[40].mxu1 }
 0x284   :  { %v4002_v25 = vadd.f32 %v1214_v8, %v3905_v47  ;;  %v1216_v28 = vpop.f32.mrb[41].mxu1  ;;  %v3002_v47 = vld [vmem:[%s4314_s5 + $0x80] sm:$0xff]  }
 0x285   :  { %v1217_v33 = vpop.f32.mrb[42].mxu1  ;;  %2773 = vmatpush3.bf16.msra.mxu1 %v3002_v47 }
 0x286   :  { %v4011_v21 = vadd.f32 %v1217_v33, %v3909_v19  ;;  %v1219_v35 = vpop.f32.mrb[43].mxu1  ;;  %v3008_v19 = vld [vmem:[%s4314_s5 + $0x10] sm:$0xff]   ;;  %2774 = vmatprep.subr.bf16.mxu1 %v3005_v62  ;;  %v3017_v33 = vld [vmem:[%s4314_s5 + $0xd8] sm:$0xff]  }
 0x287   :  { %2755 = vmatpush3.bf16.msra.mxu0 %v3008_v19  ;;  %v3021_v35 = vld [vmem:[%s4314_s5 + $0x78] sm:$0xff]  }
 0x288   :  { %2756 = vmatprep.subr.bf16.mxu0 %v3009_v55  ;;  %v3024_v55 = vld [vmem:[%s4314_s5 + $0xa0] sm:$0xff]  }
 0x28b   :  { %v1222_v31 = vpop.f32.mrb[44].mxu1  ;;  %v4025_v40 = vpop.f32.mrb[124].mxu0  ;;  %2757 = vmatpush3.bf16.msra.mxu0 %v3010_v0 }
 0x28c   :  { %v4028_v48 = vadd.f32 %v1222_v31, %v3919_v16  ;;  %v1224_v26 = vpop.f32.mrb[45].mxu1  ;;  %v1618_v50 = vpop.f32.mrb[125].mxu0  ;;  %v3007_v16 = vld [vmem:[%s4314_s5 + $0x88] sm:$0xff]   ;;  %2758 = vmatprep.subr.bf16.mxu0 %v3012_v5 }
 0x28d   :  { %v1225_v46 = vpop.f32.mrb[46].mxu1  ;;  %v4033_v27 = vpop.f32.mrb[126].mxu0  ;;  %2775 = vmatpush3.bf16.msra.mxu1 %v3007_v16 }
 0x28e   :  { %v4039_v57 = vadd.f32 %v1225_v46, %v3923_v30  ;;  %v1227_v58 = vpop.f32.mrb[47].mxu1  ;;  %v1621_v60 = vpop.f32.mrb[127].mxu0  ;;  %v3014_v30 = vld [vmem:[%s4314_s5 + $0x20] sm:$0xff]   ;;  %2776 = vmatprep.subr.bf16.mxu1 %v3011_v7  ;;  %v3027_v7 = vld [vmem:[%s4314_s5 + $0xf0] sm:$0xff]  }
 0x28f   :  { %2759 = vmatpush3.bf16.msra.mxu0 %v3014_v30  ;;  %v3025_v60 = vld [vmem:[%s4314_s5 + $0xe8] sm:$0xff]  }
 0x290   :  { %2760 = vmatprep.subr.bf16.mxu0 %v3015_v14  ;;  %v3026_v30 = vld [vmem:[%s4314_s5 + $0xa8] sm:$0xff]  }
 0x293   :  { %v1230_v44 = vpop.f32.mrb[48].mxu1  ;;  %2761 = vmatpush3.bf16.msra.mxu0 %v3016_v1 }
 0x294   :  { %v4054_v6 = vadd.f32 %v1230_v44, %v3933_v45  ;;  %v1232_v59 = vpop.f32.mrb[49].mxu1  ;;  %v3013_v45 = vld [vmem:[%s4314_s5 + $0x90] sm:$0xff]   ;;  %2762 = vmatprep.subr.bf16.mxu0 %v3018_v23 }
 0x295   :  { %v1233_v11 = vpop.f32.mrb[50].mxu1  ;;  %2777 = vmatpush3.bf16.msra.mxu1 %v3013_v45 }
 0x296   :  { %v4063_v17 = vadd.f32 %v1233_v11, %v3937_v36  ;;  %v1235_v22 = vpop.f32.mrb[51].mxu1  ;;  %v3020_v36 = vld [vmem:[%s4314_s5 + $0x30] sm:$0xff]   ;;  %2778 = vmatprep.subr.bf16.mxu1 %v3017_v33  ;;  %v3029_v11 = vld [vmem:[%s4314_s5 + $0xf8] sm:$0xff]  }
 0x297   :  { %2763 = vmatpush3.bf16.msra.mxu0 %v3020_v36 }
 0x298   :  { %2764 = vmatprep.subr.bf16.mxu0 %v3021_v35 }
 0x29b   :  { %v1238_v8 = vpop.f32.mrb[52].mxu1  ;;  %2765 = vmatpush3.bf16.msra.mxu0 %v3022_v18 }
 0x29c   :  { %v4078_v28 = vadd.f32 %v1238_v8, %v3947_v53  ;;  %v1240_v12 = vpop.f32.mrb[53].mxu1  ;;  %v3019_v53 = vld [vmem:[%s4314_s5 + $0x98] sm:$0xff]  }
 0x29d   :  { %v1241_v13 = vpop.f32.mrb[54].mxu1  ;;  %2779 = vmatpush3.bf16.msra.mxu1 %v3019_v53 }
 0x29e   :  { %v4087_v47 = vadd.f32 %v1241_v13, %v3951_v42  ;;  %v1243_v39 = vpop.f32.mrb[55].mxu1  ;;  %v3023_v42 = vld [vmem:[%s4314_s5 + $0xe0] sm:$0xff]  }
 0x29f   :  { %2780 = vmatprep.subr.bf16.mxu1 %v3023_v42 }
 0x2a1   :  { %2781 = vmatpush3.bf16.msra.mxu1 %v3024_v55 }
 0x2a2   :  { %2782 = vmatprep.subr.bf16.mxu1 %v3025_v60 }
 0x2a3   :  { %v1246_v19 = vpop.f32.mrb[56].mxu1 }
 0x2a4   :  { %v4096_v31 = vadd.f32 %v1246_v19, %v3963_v37  ;;  %v1248_v26 = vpop.f32.mrb[57].mxu1 }
 0x2a5   :  { %v1249_v50 = vpop.f32.mrb[58].mxu1  ;;  %2783 = vmatpush3.bf16.msra.mxu1 %v3026_v30 }
 0x2a6   :  { %v4102_v62 = vadd.f32 %v1249_v50, %v3967_v2  ;;  %v1251_v46 = vpop.f32.mrb[59].mxu1  ;;  %2784 = vmatprep.subr.bf16.mxu1 %v3027_v7 }
 0x2ab   :  { %v1254_v58 = vpop.f32.mrb[60].mxu1 }
 0x2ac   :  { %v4108_v37 = vadd.f32 %v1254_v58, %v3971_v29  ;;  %v1256_v16 = vpop.f32.mrb[61].mxu1 }
 0x2ad   :  { %v1257_v0 = vpop.f32.mrb[62].mxu1 }
 0x2ae   :  { %v4114_v2 = vadd.f32 %v1257_v0, %v3975_v51  ;;  %v1259_v5 = vpop.f32.mrb[63].mxu1  ;;  %v3028_v51 = vld [vmem:[%s4314_s5 + $0xb0] sm:$0xff]  }
 0x2af   :  { %2785 = vmatpush3.bf16.msra.mxu1 %v3028_v51 }
 0x2b0   :  { %2786 = vmatprep.subr.bf16.mxu1 %v3029_v11 }
 0x2b3   :  { %v1371_v44 = vpop.f32.mrb[64].mxu1 }
 0x2b4   :  { %v1434_v29 = vadd.f32 %v1371_v44, %v3980_v10  ;;  %v1373_v59 = vpop.f32.mrb[65].mxu1  ;;  %v3030_v10 = vld [vmem:[%s4314_s5 + $0xb8] sm:$0xff]  }
 0x2b5   :  { %v1374_v14 = vpop.f32.mrb[66].mxu1  ;;  %2787 = vmatpush3.bf16.msra.mxu1 %v3030_v10 }
 0x2b6   :  { %v1435_v22 = vadd.f32 %v1374_v14, %v3983_v41  ;;  %v1376_v45 = vpop.f32.mrb[67].mxu1  ;;  %v4131_v1 = vadd.f32 %v3907_v34, %v1434_v29 }
 0x2b8   :  { %v4137_v23 = vadd.f32 %v3911_v20, %v1435_v22 }
 0x2bb   :  { %v1379_v36 = vpop.f32.mrb[68].mxu1 }
 0x2bc   :  { %v1436_v8 = vadd.f32 %v1379_v36, %v3988_v4  ;;  %v1381_v12 = vpop.f32.mrb[69].mxu1 }
 0x2bd   :  { %v1382_v41 = vpop.f32.mrb[70].mxu1 }
 0x2be   :  { %v1437_v33 = vadd.f32 %v1382_v41, %v3993_v61  ;;  %v1384_v34 = vpop.f32.mrb[71].mxu1  ;;  %v1625_v13 = vadd.f32 %v3921_v24, %v1436_v8 }
 0x2c0   :  { %v4143_v35 = vadd.f32 %v3925_v32, %v1437_v33 }
 0x2c3   :  { %v1387_v39 = vpop.f32.mrb[72].mxu1 }
 0x2c4   :  { %v1438_v53 = vadd.f32 %v1387_v39, %v4002_v25  ;;  %v1389_v20 = vpop.f32.mrb[73].mxu1 }
 0x2c5   :  { %v1390_v18 = vpop.f32.mrb[74].mxu1 }
 0x2c6   :  { %v1439_v19 = vadd.f32 %v1390_v18, %v4011_v21  ;;  %v1392_v26 = vpop.f32.mrb[75].mxu1  ;;  %v4148_v4 = vadd.f32 %v3935_v49, %v1438_v53 }
 0x2c8   :  { %v4151_v42 = vadd.f32 %v3939_v38, %v1439_v19 }
 0x2cb   :  { %v1395_v61 = vpop.f32.mrb[76].mxu1 }
 0x2cc   :  { %v1440_v24 = vadd.f32 %v1395_v61, %v4028_v48  ;;  %v1397_v50 = vpop.f32.mrb[77].mxu1 }
 0x2cd   :  { %v1398_v32 = vpop.f32.mrb[78].mxu1 }
 0x2ce   :  { %v1441_v46 = vadd.f32 %v1398_v32, %v4039_v57  ;;  %v1400_v55 = vpop.f32.mrb[79].mxu1  ;;  %v4156_v25 = vadd.f32 %v3949_v56, %v1440_v24 }
 0x2d0   :  { %v4159_v21 = vadd.f32 %v3953_v43, %v1441_v46 }
 0x2d3   :  { %v1403_v58 = vpop.f32.mrb[80].mxu1 }
 0x2d4   :  { %v1442_v49 = vadd.f32 %v1403_v58, %v4054_v6  ;;  %v1405_v16 = vpop.f32.mrb[81].mxu1 }
 0x2d5   :  { %v1406_v38 = vpop.f32.mrb[82].mxu1 }
 0x2d6   :  { %v1443_v60 = vadd.f32 %v1406_v38, %v4063_v17  ;;  %v1408_v0 = vpop.f32.mrb[83].mxu1  ;;  %v4164_v48 = vadd.f32 %v3965_v3, %v1442_v49 }
 0x2d8   :  { %v4167_v57 = vadd.f32 %v3969_v9, %v1443_v60 }
 0x2db   :  { %v1411_v5 = vpop.f32.mrb[84].mxu1 }
 0x2dc   :  { %v1444_v56 = vadd.f32 %v1411_v5, %v4078_v28  ;;  %v1413_v30 = vpop.f32.mrb[85].mxu1 }
 0x2dd   :  { %v1414_v43 = vpop.f32.mrb[86].mxu1 }
 0x2de   :  { %v1445_v44 = vadd.f32 %v1414_v43, %v4087_v47  ;;  %v1416_v29 = vpop.f32.mrb[87].mxu1  ;;  %v4172_v6 = vadd.f32 %v3973_v52, %v1444_v56 }
 0x2e0   :  { %v4175_v17 = vadd.f32 %v3977_v54, %v1445_v44 }
 0x2e3   :  { %v1419_v59 = vpop.f32.mrb[88].mxu1 }
 0x2e4   :  { %v1446_v3 = vadd.f32 %v1419_v59, %v4096_v31  ;;  %v1421_v7 = vpop.f32.mrb[89].mxu1 }
 0x2e5   :  { %v1422_v9 = vpop.f32.mrb[90].mxu1 }
 0x2e6   :  { %v1447_v51 = vadd.f32 %v1422_v9, %v4102_v62  ;;  %v1424_v11 = vpop.f32.mrb[91].mxu1  ;;  %v4180_v28 = vadd.f32 %v3985_v63, %v1446_v3 }
 0x2e8   :  { %v4183_v47 = vadd.f32 %v3990_v15, %v1447_v51  ;;  %v4197_v15 = vld [vmem:[%s4315_s4] ss:$0 sm:$0xff] }
 0x2eb   :  { %v1427_v14 = vpop.f32.mrb[92].mxu1 }
 0x2ec   :  { %v1448_v52 = vadd.f32 %v1427_v14, %v4108_v37  ;;  %v1429_v22 = vpop.f32.mrb[93].mxu1 }
 0x2ed   :  { %v1430_v54 = vpop.f32.mrb[94].mxu1 }
 0x2ee   :  { %v1449_v45 = vadd.f32 %v1430_v54, %v4114_v2  ;;  %v4188_v31 = vadd.f32 %v4025_v40, %v1448_v52  ;;  %v1432_v10 = vpop.f32.mrb[95].mxu1 }
 0x2f0   :  { %v4191_v62 = vadd.f32 %v4033_v27, %v1449_v45 }
 0x2f3   :  { %v1749_v36 = vpop.f32.mrb[96].mxu1 }
 0x2f4   :  { %v1812_v63 = vadd.f32 %v1749_v36, %v4131_v1  ;;  %v1751_v8 = vpop.f32.mrb[97].mxu1 }
 0x2f5   :  { %v1752_v37 = vpop.f32.mrb[98].mxu1 }
 0x2f6   :  { %v1813_v12 = vadd.f32 %v1752_v37, %v4137_v23  ;;  %v1754_v2 = vpop.f32.mrb[99].mxu1  ;;  %v1835_v40 = vadd.f32 %v4197_v15, %v1812_v63 }
 0x2f8   :  { %v1836_v41 = vadd.f32 %v4197_v15, %v1813_v12 }
 0x2fa   :  { %v1851_v33 = vpack.c.bf16 %v1836_v41, %v1835_v40 }
 0x2fb   :  { %v1757_v27 = vpop.f32.mrb[100].mxu1 }
 0x2fc   :  { %v1814_v34 = vadd.f32 %v1757_v27, %v1625_v13  ;;  %v1759_v39 = vpop.f32.mrb[101].mxu1  ;;  %3143 = vtanh.bf16 %v1851_v33 }
 0x2fd   :  { %v1760_v53 = vpop.f32.mrb[102].mxu1 }
 0x2fe   :  { %v1815_v1 = vadd.f32 %v1760_v53, %v4143_v35  ;;  %v1762_v20 = vpop.f32.mrb[103].mxu1  ;;  %v1837_v18 = vadd.f32 %v4197_v15, %v1814_v34 }
 0x300   :  { %v1838_v19 = vadd.f32 %v4197_v15, %v1815_v1 }
 0x302   :  { %v1852_v26 = vpack.c.bf16 %v1838_v19, %v1837_v18 }
 0x303   :  { %v1765_v23 = vpop.f32.mrb[104].mxu1 }
 0x304   :  { %3145 = vtanh.bf16 %v1852_v26  ;;  %v1816_v61 = vadd.f32 %v1765_v23, %v4148_v4  ;;  %v1767_v24 = vpop.f32.mrb[105].mxu1 }
 0x305   :  { %v1768_v50 = vpop.f32.mrb[106].mxu1 }
 0x306   :  { %v1817_v32 = vadd.f32 %v1768_v50, %v4151_v42  ;;  %v1770_v13 = vpop.f32.mrb[107].mxu1  ;;  %v1839_v46 = vadd.f32 %v4197_v15, %v1816_v61 }
 0x307   :  { %v3144_v60 = vpop.eup %3143  ;;  %v3033_v13 = vld [vmem:[%s4316_s7 + $0x10] sm:$0xff]  }
 0x308   :  { %v1840_v35 = vadd.f32 %v4197_v15, %v1817_v32 }
 0x30a   :  { %v1853_v55 = vpack.c.bf16 %v1840_v35, %v1839_v46  ;;  %v3034_v46 = vld [vmem:[%s4316_s7 + $0x18] sm:$0xff]   ;;  %v3035_v35 = vld [vmem:[%s4316_s7 + $0x20] sm:$0xff]  }
 0x30b   :  { %v1773_v58 = vpop.f32.mrb[108].mxu1 }
 0x30c   :  { %v1818_v49 = vadd.f32 %v1773_v58, %v4156_v25  ;;  %v1775_v16 = vpop.f32.mrb[109].mxu1  ;;  %3147 = vtanh.bf16 %v1853_v55  ;;  %v3036_v55 = vld [vmem:[%s4316_s7 + $0x28] sm:$0xff]   ;;  %v3037_v58 = vld [vmem:[%s4316_s7 + $0x30] sm:$0xff]  }
 0x30d   :  { %v1776_v38 = vpop.f32.mrb[110].mxu1  ;;  %v3039_v16 = vld [vmem:[%s4317_s9] sm:$0xff]  }
 0x30e   :  { %v1819_v0 = vadd.f32 %v1776_v38, %v4159_v21  ;;  %v1778_v5 = vpop.f32.mrb[111].mxu1  ;;  %v1841_v56 = vadd.f32 %v4197_v15, %v1818_v49  ;;  %v3038_v49 = vld [vmem:[%s4316_s7 + $0x38] sm:$0xff]   ;;  %v3040_v38 = vld [vmem:[%s4317_s9 + $0x8] sm:$0xff]  }
 0x30f   :  { %v3146_v4 = vpop.eup %3145 }
 0x310   :  { %v1842_v42 = vadd.f32 %v4197_v15, %v1819_v0  ;;  %v1867_v30 = vadd.bf16 %v3146_v4, %v3144_v60  ;;  %v3041_v60 = vld [vmem:[%s4317_s9 + $0x10] sm:$0xff]  }
 0x312   :  { %v1854_v43 = vpack.c.bf16 %v1842_v42, %v1841_v56 }
 0x313   :  { %v1781_v44 = vpop.f32.mrb[112].mxu1 }
 0x314   :  { %3149 = vtanh.bf16 %v1854_v43  ;;  %v1820_v29 = vadd.f32 %v1781_v44, %v4164_v48  ;;  %v1783_v59 = vpop.f32.mrb[113].mxu1  ;;  %v2699_v43 = vld [vmem:[%s4318_s6] ss:$0 sm:$0xff] }
 0x315   :  { %v1784_v25 = vpop.f32.mrb[114].mxu1 }
 0x316   :  { %v1821_v3 = vadd.f32 %v1784_v25, %v4167_v57  ;;  %v1786_v7 = vpop.f32.mrb[115].mxu1  ;;  %v1843_v21 = vadd.f32 %v4197_v15, %v1820_v29 }
 0x317   :  { %v3148_v54 = vpop.eup %3147 }
 0x318   :  { %v1844_v9 = vadd.f32 %v4197_v15, %v1821_v3 }
 0x31a   :  { %v1855_v51 = vpack.c.bf16 %v1844_v9, %v1843_v21 }
 0x31b   :  { %v1789_v11 = vpop.f32.mrb[116].mxu1 }
 0x31c   :  { %v1822_v14 = vadd.f32 %v1789_v11, %v4172_v6  ;;  %v1791_v52 = vpop.f32.mrb[117].mxu1  ;;  %3151 = vtanh.bf16 %v1855_v51 }
 0x31d   :  { %v1792_v22 = vpop.f32.mrb[118].mxu1 }
 0x31e   :  { %v1823_v45 = vadd.f32 %v1792_v22, %v4175_v17  ;;  %v1794_v10 = vpop.f32.mrb[119].mxu1  ;;  %v1845_v36 = vadd.f32 %v4197_v15, %v1822_v14  ;;  %v3042_v22 = vld [vmem:[%s4317_s9 + $0x18] sm:$0xff]  }
 0x31f   :  { %v3150_v48 = vpop.eup %3149  ;;  %v3045_v10 = vld [vmem:[%s4317_s9 + $0x30] sm:$0xff]  }
 0x320   :  { %v1846_v57 = vadd.f32 %v4197_v15, %v1823_v45  ;;  %v1868_v63 = vadd.bf16 %v3150_v48, %v3148_v54  ;;  %v3043_v54 = vld [vmem:[%s4317_s9 + $0x20] sm:$0xff]   ;;  %v3044_v45 = vld [vmem:[%s4317_s9 + $0x28] sm:$0xff]   ;;  %v3046_v48 = vld [vmem:[%s4317_s9 + $0x38] sm:$0xff]  }
 0x322   :  { %v1856_v8 = vpack.c.bf16 %v1846_v57, %v1845_v36  ;;  %2166 = vmatprep.mubr.bf16.mxu0 %v1868_v63  ;;  %v2732_v36 = vld [vmem:[%s4319_s8] ss:$0 sm:$0xff] }
 0x323   :  { %v1797_v37 = vpop.f32.mrb[120].mxu1  ;;  %2167 = vmatmul.mubr.bf16.vlgmr.msra.gmra.mrb[128].mxu0 %v1867_v30 }
 0x324   :  { %3153 = vtanh.bf16 %v1856_v8  ;;  %v1824_v6 = vadd.f32 %v1797_v37, %v4180_v28  ;;  %v1799_v12 = vpop.f32.mrb[121].mxu1 }
 0x325   :  { %v1800_v2 = vpop.f32.mrb[122].mxu1 }
 0x326   :  { %v1825_v40 = vadd.f32 %v1800_v2, %v4183_v47  ;;  %v1802_v17 = vpop.f32.mrb[123].mxu1  ;;  %v1847_v41 = vadd.f32 %v4197_v15, %v1824_v6 }
 0x327   :  { %v3152_v20 = vpop.eup %3151  ;;  %v2741_v17 = vld [vmem:[%s4320_s10] ss:$0 sm:$0xff] }
 0x328   :  { %v1848_v33 = vadd.f32 %v4197_v15, %v1825_v40 }
 0x32a   :  { %v1857_v27 = vpack.c.bf16 %v1848_v33, %v1847_v41 }
 0x32b   :  { %v1805_v34 = vpop.f32.mrb[124].mxu1 }
 0x32c   :  { %v1826_v39 = vadd.f32 %v1805_v34, %v4188_v31  ;;  %v1807_v53 = vpop.f32.mrb[125].mxu1  ;;  %3155 = vtanh.bf16 %v1857_v27  ;;  %v3164_v31 = vmov 0.0  }
 0x32d   :  { %v1808_v1 = vpop.f32.mrb[126].mxu1  ;;  %2812 = vmatprep.subr.bf16.mxu0 %v3164_v31  ;;  %2832 = vmatprep.subr.bf16.mxu1 %v3164_v31 }
 0x32e   :  { %v1827_v18 = vadd.f32 %v1808_v1, %v4191_v62  ;;  %v1810_v19 = vpop.f32.mrb[127].mxu1  ;;  %v1849_v26 = vadd.f32 %v4197_v15, %v1826_v39  ;;  %v3031_v62 = vld [vmem:[%s4316_s7] sm:$0xff]   ;;  %2828 = vmatprep.mubr.msk.bf16.mxu0 %vm3165_vm3, %v3164_v31 }
 0x32f   :  { %v3154_v28 = vpop.eup %3153  ;;  %2813 = vmatpush3.bf16.msra.mxu0 %v3031_v62 }
 0x330   :  { %v1850_v47 = vadd.f32 %v4197_v15, %v1827_v18  ;;  %v1869_v23 = vadd.bf16 %v3154_v28, %v3152_v20  ;;  %v3032_v15 = vld [vmem:[%s4316_s7 + $0x8] sm:$0xff]   ;;  %2814 = vmatprep.subr.bf16.mxu0 %v3164_v31 }
 0x332   :  { %v1858_v61 = vpack.c.bf16 %v1850_v47, %v1849_v26 }
 0x333   :  { %2815 = vmatpush3.bf16.msra.mxu0 %v3032_v15 }
 0x334   :  { %3157 = vtanh.bf16 %v1858_v61  ;;  %2816 = vmatprep.subr.bf16.mxu0 %v3164_v31 }
 0x337   :  { %v3156_v24 = vpop.eup %3155  ;;  %2817 = vmatpush3.bf16.msra.mxu0 %v3033_v13 }
 0x338   :  { %2818 = vmatprep.subr.bf16.mxu0 %v3164_v31 }
 0x33b   :  { %2819 = vmatpush3.bf16.msra.mxu0 %v3034_v46 }
 0x33c   :  { %2820 = vmatprep.subr.bf16.mxu0 %v3164_v31 }
 0x33f   :  { %v3158_v50 = vpop.eup %3157  ;;  %2821 = vmatpush3.bf16.msra.mxu0 %v3035_v35 }
 0x340   :  { %v1870_v32 = vadd.bf16 %v3158_v50, %v3156_v24  ;;  %2822 = vmatprep.subr.bf16.mxu0 %v3164_v31 }
 0x342   :  { %2207 = vmatprep.mubr.bf16.mxu1 %v1870_v32 }
 0x343   :  { %2208 = vmatmul.mubr.bf16.vlgmr.msra.gmra.mrb[128].mxu1 %v1869_v23  ;;  %2823 = vmatpush3.bf16.msra.mxu0 %v3036_v55 }
 0x344   :  { %2824 = vmatprep.subr.bf16.mxu0 %v3164_v31  ;;  %2848 = vmatprep.mubr.msk.bf16.mxu1 %vm3165_vm3, %v3164_v31 }
 0x345   :  { %2833 = vmatpush3.bf16.msra.mxu1 %v3039_v16 }
 0x346   :  { %2834 = vmatprep.subr.bf16.mxu1 %v3164_v31 }
 0x347   :  { %2825 = vmatpush3.bf16.msra.mxu0 %v3037_v58 }
 0x348   :  { %2826 = vmatprep.subr.bf16.mxu0 %v3164_v31 }
 0x349   :  { %2835 = vmatpush3.bf16.msra.mxu1 %v3040_v38 }
 0x34a   :  { %2836 = vmatprep.subr.bf16.mxu1 %v3164_v31 }
 0x34b   :  { %2827 = vmatpush3.bf16.msra.mxu0 %v3038_v49 }
 0x34d   :  { %2837 = vmatpush3.bf16.msra.mxu1 %v3041_v60 }
 0x34e   :  { %2838 = vmatprep.subr.bf16.mxu1 %v3164_v31 }
 0x351   :  { %2839 = vmatpush3.bf16.msra.mxu1 %v3042_v22 }
 0x352   :  { %2840 = vmatprep.subr.bf16.mxu1 %v3164_v31 }
 0x355   :  { %2841 = vmatpush3.bf16.msra.mxu1 %v3043_v54 }
 0x356   :  { %2842 = vmatprep.subr.bf16.mxu1 %v3164_v31 }
 0x359   :  { %2843 = vmatpush3.bf16.msra.mxu1 %v3044_v45 }
 0x35a   :  { %2844 = vmatprep.subr.bf16.mxu1 %v3164_v31 }
 0x35d   :  { %2845 = vmatpush3.bf16.msra.mxu1 %v3045_v10 }
 0x35e   :  { %2846 = vmatprep.subr.bf16.mxu1 %v3164_v31 }
 0x361   :  { %2847 = vmatpush3.bf16.msra.mxu1 %v3046_v48 }
 0x3f6   :  { %v2766_v0 = vpop.f32.mrb[128].mxu0 }
 0x3f7   :  { %v2767_v5 = vpop.f32.mrb[129].mxu0 }
 0x3f8   :  { %v2768_v4 = vadd.f32 %v2767_v5, %v2766_v0  ;;  %v2769_v56 = vpop.f32.mrb[130].mxu0 }
 0x3f9   :  { %v2770_v42 = vpop.f32.mrb[131].mxu0 }
 0x3fa   :  { %v2771_v30 = vadd.f32 %v2770_v42, %v2769_v56  ;;  %v2169_v59 = vadd.f32 %v2768_v4, %v2699_v43 }
 0x3fc   :  { %v2172_v21 = vadd.f32 %v2771_v30, %v2699_v43 }
 0x416   :  { %v2788_v44 = vpop.f32.mrb[128].mxu1 }
 0x417   :  { %v2789_v29 = vpop.f32.mrb[129].mxu1 }
 0x418   :  { %v2790_v25 = vadd.f32 %v2789_v29, %v2788_v44  ;;  %v2791_v3 = vpop.f32.mrb[130].mxu1 }
 0x419   :  { %v2792_v7 = vpop.f32.mrb[131].mxu1 }
 0x41a   :  { %v2210_v9 = vadd.f32 %v2790_v25, %v2169_v59  ;;  %v2793_v51 = vadd.f32 %v2792_v7, %v2791_v3 }
 0x41c   :  { %v2213_v11 = vadd.f32 %v2793_v51, %v2172_v21 }
 0x41e   :  { %v2216_v14 = vpack.c.bf16 %v2213_v11, %v2210_v9 }
 0x420   :  { %3159 = vtanh.bf16 %v2216_v14 }
 0x42b   :  { %v3160_v52 = vpop.eup %3159 }
 0x42c   :  { %2829 = vmatmul.mubr.bf16.vlgmr.msra.gmra.mrb[132].mxu0 %v3160_v52 }
 0x4ff   :  { %v2323_v57 = vpop.f32.mrb[132].mxu0 }
 0x500   :  { %v2830_v63 = vpop.f32.mrb[133].mxu0  ;;  %v2324_v37 = vadd.f32 %v2732_v36, %v2323_v57 }
 0x501   :  { %v2326_v8 = vpop.f32.mrb[134].mxu0 }
 0x502   :  { %v2327_v6 = vadd.f32 %v2732_v36, %v2326_v8  ;;  %v2831_v12 = vpop.f32.mrb[135].mxu0 }
 0x504   :  { %v2330_v2 = vpack.c.bf16 %v2327_v6, %v2324_v37 }
 0x506   :  { %3161 = vtanh.bf16 %v2330_v2 }
 0x511   :  { %v3162_v40 = vpop.eup %3161 }
 0x512   :  { %2849 = vmatmul.mubr.bf16.vlgmr.msra.gmra.mrb[132].mxu1 %v3162_v40 }
 0x5e5   :  { %v2437_v41 = vpop.f32.mrb[132].mxu1 }
 0x5e6   :  { %v2438_v33 = vadd.f32 %v2741_v17, %v2437_v41  ;;  %v2850_v27 = vpop.f32.mrb[133].mxu1 }
 0x5e7   :  { %v2440_v34 = vpop.f32.mrb[134].mxu1 }
 0x5e8   :  { %2444 = vst [vmem:[%s4321_s11] sm:$0xff] %v2438_v33  ;;  %v2441_v39 = vadd.f32 %v2741_v17, %v2440_v34  ;;  %v2851_v53 = vpop.f32.mrb[135].mxu1 }
 0x5ea   :  { %2445 = vst [vmem:[%s4321_s11 + $0x8] sm:$0xff] %v2441_v39 }

</bundles_post_ra>
